<compile_context>
chip_gen: v7x
topology: tpu7x:2x2x1
jax: 0.10.0
libtpu: 0.0.40
codegen_flags: <defaults>
</compile_context>

<pallas_src>
import functools

import jax
import jax.numpy as jnp
from jax.experimental import pallas as pl
from jax.experimental.pallas import tpu as pltpu

_EPS = 1e-6


def _round_up(n, m):
    return ((n + m - 1) // m) * m


def _vmem_capacity_bytes():
    try:
        return int(pltpu.get_tpu_info().vmem_capacity_bytes)
    except Exception:
        return 64 * 1024 * 1024  # conservative fallback (v7x per-TC size)


def _layer_norm(x, mask, gamma, beta, inv_d, apply_mask):
    """LayerNorm over the (real) feature lanes; padded lanes of x are zero."""
    mean = jnp.sum(x, axis=-1, keepdims=True) * inv_d
    centered = x - mean
    if apply_mask:
        # Precomputed 0/1 lane mask (resident input) zeroes the padded lanes,
        # which would otherwise hold -mean and pollute the variance.
        centered = centered * mask
    var = jnp.sum(centered * centered, axis=-1, keepdims=True) * inv_d
    xn = centered * jax.lax.rsqrt(var + _EPS)
    return xn * gamma + beta  # padded gamma/beta are zero -> padded lanes stay 0


# --------------------------------------------------------------------------
# Path 1: weights fully resident in VMEM (single-buffered), grid over row tiles
# --------------------------------------------------------------------------
def _ffn_resident_kernel(x_ref, mask_ref, gamma_ref, beta_ref,
                         w1_ref, b1_ref, w2_ref, b2_ref, o_ref,
                         *, inv_d, apply_mask):
    x = x_ref[...]                                        # (tm, d_in_p) f32
    xn = _layer_norm(x, mask_ref[...], gamma_ref[...], beta_ref[...],
                     inv_d, apply_mask)

    h = jnp.dot(xn.astype(jnp.bfloat16), w1_ref[...],
                preferred_element_type=jnp.float32) + b1_ref[...]
    h = jnp.maximum(h, 0.0)                               # (tm, d_hid_p) f32
    y = jnp.dot(h.astype(jnp.bfloat16), w2_ref[...],
                preferred_element_type=jnp.float32) + b2_ref[...]

    o_ref[...] = (y + x).astype(o_ref.dtype)              # residual add (f32)


# --------------------------------------------------------------------------
# Path 2: d_hid-streaming fallback (weights too large for resident VMEM)
# --------------------------------------------------------------------------
def _ffn_stream_kernel(x_ref, mask_ref, gamma_ref, beta_ref,
                       w1_ref, b1_ref, w2_ref, b2_ref, o_ref,
                       xn_scratch, acc_scratch, *, inv_d, apply_mask):
    k = pl.program_id(1)

    @pl.when(k == 0)
    def _():
        xn = _layer_norm(x_ref[...], mask_ref[...], gamma_ref[...],
                         beta_ref[...], inv_d, apply_mask)
        xn_scratch[...] = xn.astype(jnp.bfloat16)
        acc_scratch[...] = jnp.zeros_like(acc_scratch)

    h = jnp.dot(xn_scratch[...], w1_ref[...],
                preferred_element_type=jnp.float32) + b1_ref[...]
    h = jnp.maximum(h, 0.0)                               # (tm, tk) f32
    acc_scratch[...] += jnp.dot(h.astype(jnp.bfloat16), w2_ref[...],
                                preferred_element_type=jnp.float32)

    @pl.when(k == pl.num_programs(1) - 1)
    def _():
        o_ref[...] = (acc_scratch[...] + b2_ref[...] + x_ref[...]).astype(o_ref.dtype)


# --------------------------------------------------------------------------
# VMEM footprint estimates (bytes) used to size tm / tk and pick the path
# --------------------------------------------------------------------------
def _resident_bytes(tm, d_in_p, d_hid_p):
    io = 2 * 2 * tm * d_in_p * 4                      # x + out, double-buffered f32
    weights = 2 * d_in_p * d_hid_p * 2                # w1 + w2 bf16, single-buffered
    small = 8 * (d_in_p + d_hid_p) * 4                # gamma/beta/biases/mask
    interm = tm * d_hid_p * (4 + 2) + tm * d_in_p * (4 + 2)  # h / xn (f32 + bf16)
    return io + weights + small + interm


def _stream_bytes(tm, tk, d_in_p):
    io = 2 * 2 * tm * d_in_p * 4                      # x + out, double-buffered f32
    weights = 2 * 2 * (d_in_p * tk) * 2 * 1           # w1 block, double-buffered bf16
    weights += 2 * (tk * d_in_p) * 2                  # w2 block, double-buffered bf16
    scratch = tm * d_in_p * (2 + 4)                   # xn bf16 + acc f32
    interm = tm * tk * (4 + 2)                        # h f32 + bf16
    small = 8 * (d_in_p + tk) * 4
    return io + weights + scratch + interm + small


def position_wise_feed_forward(x, gamma, beta, w1, b1, w2, b2, *,
                               tm=512, tk=512, force_stream=False):
    """x: (B, S, d_in) float32. Weights stored as (in_features, out_features).

    Returns (B, S, d_in) float32, matching the PyTorch eval-mode forward.
    """
    B, S, d_in = x.shape
    d_hid = w1.shape[1]
    rows = B * S

    d_in_p = _round_up(d_in, 128)
    d_hid_p = _round_up(d_hid, 128)

    # --- per-generation VMEM budget -------------------------------------
    vmem_cap = _vmem_capacity_bytes()
    vmem_limit = min(int(vmem_cap * 0.75), 112 * 1024 * 1024)
    budget = int(vmem_limit * 0.8)

    # --- choose path and tile sizes --------------------------------------
    tm_req = max(8, min(_round_up(tm, 8), _round_up(rows, 8)))

    tm_res = tm_req
    while tm_res > 8 and _resident_bytes(tm_res, d_in_p, d_hid_p) > budget:
        tm_res = max(8, _round_up(tm_res // 2, 8))
    use_stream = force_stream or _resident_bytes(tm_res, d_in_p, d_hid_p) > budget

    if use_stream:
        tm_ = tm_req
        tk_ = max(128, min(_round_up(tk, 128), d_hid_p))
        while _stream_bytes(tm_, tk_, d_in_p) > budget:
            if tk_ > 128:
                tk_ = max(128, (tk_ // 2) // 128 * 128)
            elif tm_ > 8:
                tm_ = max(8, _round_up(tm_ // 2, 8))
            else:
                break
        d_hid_p = _round_up(d_hid, tk_)               # make tk_ divide d_hid_p
    else:
        tm_ = tm_res

    rows_p = _round_up(rows, tm_)

    # --- pad inputs / params (only when actually needed) -----------------
    x2d = x.reshape(rows, d_in)
    if rows_p != rows or d_in_p != d_in:
        x2d = jnp.pad(x2d, ((0, rows_p - rows), (0, d_in_p - d_in)))

    def _pad_vec(v, n):
        v = v.reshape(1, -1).astype(jnp.float32)
        return v if v.shape[1] == n else jnp.pad(v, ((0, 0), (0, n - v.shape[1])))

    gamma_p = _pad_vec(gamma, d_in_p)
    beta_p = _pad_vec(beta, d_in_p)
    b1_p = _pad_vec(b1, d_hid_p)
    b2_p = _pad_vec(b2, d_in_p)
    w1_p = w1 if w1.shape == (d_in_p, d_hid_p) else jnp.pad(
        w1, ((0, d_in_p - d_in), (0, d_hid_p - d_hid)))
    w2_p = w2 if w2.shape == (d_hid_p, d_in_p) else jnp.pad(
        w2, ((0, d_hid_p - d_hid), (0, d_in_p - d_in)))
    w1_p = w1_p.astype(jnp.bfloat16)
    w2_p = w2_p.astype(jnp.bfloat16)

    apply_mask = d_in_p != d_in
    mask = (jnp.arange(d_in_p) < d_in).astype(jnp.float32).reshape(1, d_in_p)

    # --- cost estimate for the XLA scheduler ------------------------------
    cost = pl.CostEstimate(
        flops=int(4 * rows_p * d_in_p * d_hid_p + 10 * rows_p * d_in_p),
        transcendentals=int(rows_p),
        bytes_accessed=int(2 * rows_p * d_in_p * 4        # x in + out (f32)
                           + 2 * d_in_p * d_hid_p * 2     # bf16 weights
                           + 6 * (d_in_p + d_hid_p) * 4), # small params
    )

    out_shape = jax.ShapeDtypeStruct((rows_p, d_in_p), x.dtype)

    if not use_stream:
        kernel = functools.partial(_ffn_resident_kernel,
                                   inv_d=1.0 / d_in, apply_mask=apply_mask)
        const = lambda i: (0, 0)
        out2d = pl.pallas_call(
            kernel,
            out_shape=out_shape,
            grid_spec=pltpu.PrefetchScalarGridSpec(
                num_scalar_prefetch=0,
                grid=(rows_p // tm_,),
                in_specs=[
                    pl.BlockSpec((tm_, d_in_p), lambda i: (i, 0)),               # x
                    pl.BlockSpec((1, d_in_p), const, pipeline_mode=pl.Buffered(1)),       # mask
                    pl.BlockSpec((1, d_in_p), const, pipeline_mode=pl.Buffered(1)),       # gamma
                    pl.BlockSpec((1, d_in_p), const, pipeline_mode=pl.Buffered(1)),       # beta
                    pl.BlockSpec((d_in_p, d_hid_p), const, pipeline_mode=pl.Buffered(1)), # w1
                    pl.BlockSpec((1, d_hid_p), const, pipeline_mode=pl.Buffered(1)),      # b1
                    pl.BlockSpec((d_hid_p, d_in_p), const, pipeline_mode=pl.Buffered(1)), # w2
                    pl.BlockSpec((1, d_in_p), const, pipeline_mode=pl.Buffered(1)),       # b2
                ],
                out_specs=pl.BlockSpec((tm_, d_in_p), lambda i: (i, 0)),
            ),
            compiler_params=pltpu.CompilerParams(
                dimension_semantics=("parallel",),
                vmem_limit_bytes=vmem_limit,
            ),
            cost_estimate=cost,
        )(x2d, mask, gamma_p, beta_p, w1_p, b1_p, w2_p, b2_p)
    else:
        kernel = functools.partial(_ffn_stream_kernel,
                                   inv_d=1.0 / d_in, apply_mask=apply_mask)
        const = lambda i, k: (0, 0)
        out2d = pl.pallas_call(
            kernel,
            out_shape=out_shape,
            grid_spec=pltpu.PrefetchScalarGridSpec(
                num_scalar_prefetch=0,
                grid=(rows_p // tm_, d_hid_p // tk_),
                in_specs=[
                    pl.BlockSpec((tm_, d_in_p), lambda i, k: (i, 0)),            # x (row resident)
                    pl.BlockSpec((1, d_in_p), const, pipeline_mode=pl.Buffered(1)),  # mask
                    pl.BlockSpec((1, d_in_p), const, pipeline_mode=pl.Buffered(1)),  # gamma
                    pl.BlockSpec((1, d_in_p), const, pipeline_mode=pl.Buffered(1)),  # beta
                    pl.BlockSpec((d_in_p, tk_), lambda i, k: (0, k)),             # w1 block (streamed)
                    pl.BlockSpec((1, tk_), lambda i, k: (0, k)),                  # b1 block
                    pl.BlockSpec((tk_, d_in_p), lambda i, k: (k, 0)),             # w2 block (streamed)
                    pl.BlockSpec((1, d_in_p), const, pipeline_mode=pl.Buffered(1)),  # b2
                ],
                out_specs=pl.BlockSpec((tm_, d_in_p), lambda i, k: (i, 0)),
                scratch_shapes=[
                    pltpu.VMEM((tm_, d_in_p), jnp.bfloat16),   # cached LayerNorm output
                    pltpu.VMEM((tm_, d_in_p), jnp.float32),    # y accumulator
                ],
            ),
            compiler_params=pltpu.CompilerParams(
                dimension_semantics=("parallel", "arbitrary"),
                vmem_limit_bytes=vmem_limit,
            ),
            cost_estimate=cost,
        )(x2d, mask, gamma_p, beta_p, w1_p, b1_p, w2_p, b2_p)

    if rows_p != rows or d_in_p != d_in:
        out2d = out2d[:rows, :d_in]
    return out2d.reshape(B, S, d_in)


# --------------------------------------------------------------------------
# Test scaffolding
# --------------------------------------------------------------------------
def _init_params(key, d_in, d_hid):
    """Deterministic parameter init mimicking PyTorch defaults (shapes only)."""
    k1, k2, k3, k4 = jax.random.split(key, 4)
    lim1 = 1.0 / jnp.sqrt(d_in)
    w1 = jax.random.uniform(k1, (d_in, d_hid), jnp.float32, -lim1, lim1)
    b1 = jax.random.uniform(k2, (d_hid,), jnp.float32, -lim1, lim1)
    lim2 = 1.0 / jnp.sqrt(d_hid)
    w2 = jax.random.uniform(k3, (d_hid, d_in), jnp.float32, -lim2, lim2)
    b2 = jax.random.uniform(k4, (d_in,), jnp.float32, -lim2, lim2)
    gamma = jnp.ones((d_in,), jnp.float32)
    beta = jnp.zeros((d_in,), jnp.float32)
    return gamma, beta, w1, b1, w2, b2


def _reference(x, gamma, beta, w1, b1, w2, b2, matmul_dtype=jnp.float32):
    """Pure-JAX reference of the PyTorch forward (dropout in eval mode)."""
    mean = jnp.mean(x, axis=-1, keepdims=True)
    var = jnp.mean((x - mean) ** 2, axis=-1, keepdims=True)
    xn = (x - mean) * jax.lax.rsqrt(var + _EPS) * gamma + beta
    h = jnp.dot(xn.astype(matmul_dtype), w1.astype(matmul_dtype),
                preferred_element_type=jnp.float32) + b1
    h = jnp.maximum(h, 0.0)
    y = jnp.dot(h.astype(matmul_dtype), w2.astype(matmul_dtype),
                preferred_element_type=jnp.float32) + b2
    return y + x


if __name__ == "__main__":
    key = jax.random.PRNGKey(0)
    kx, kp, kp2 = jax.random.split(key, 3)

    # Small shapes; d_in/d_hid deliberately not 128-multiples to exercise the
    # lane-padding / mask path, rows = 256 for a full row tile.
    B, S, d_in, d_hid = 4, 64, 32, 64
    x = jax.random.normal(kx, (B, S, d_in), jnp.float32)
    gamma, beta, w1, b1, w2, b2 = _init_params(kp, d_in, d_hid)

    # --- resident-weights path ---
    out = position_wise_feed_forward(x, gamma, beta, w1, b1, w2, b2)
    out = jax.block_until_ready(out)
    assert out.shape == (B, S, d_in)

    ref_bf16 = _reference(x, gamma, beta, w1, b1, w2, b2, matmul_dtype=jnp.bfloat16)
    assert jnp.allclose(out, ref_bf16, atol=1e-2, rtol=1e-2), "mismatch vs bf16 reference"
    ref_f32 = _reference(x, gamma, beta, w1, b1, w2, b2)
    assert jnp.allclose(out, ref_f32, atol=5e-2, rtol=5e-2), "mismatch vs f32 reference"

    # --- forced d_hid-streaming fallback path (multi-block along d_hid) ---
    d_hid2 = 200
    gamma2, beta2, w1b, b1b, w2b, b2b = _init_params(kp2, d_in, d_hid2)
    out_s = position_wise_feed_forward(x, gamma2, beta2, w1b, b1b, w2b, b2b,
                                       tk=128, force_stream=True)
    out_s = jax.block_until_ready(out_s)
    assert out_s.shape == (B, S, d_in)
    ref_s = _reference(x, gamma2, beta2, w1b, b1b, w2b, b2b, matmul_dtype=jnp.bfloat16)
    assert jnp.allclose(out_s, ref_s, atol=1e-2, rtol=1e-2), "mismatch (streaming path)"

    print("KERNEL_OK")
</pallas_src>

<mosaic_0001>
module attributes {stable_mosaic.version = 11 : i64} {
  func.func @_ffn_resident_kernel(%arg0: i32, %arg1: memref<256x128xf32, #tpu.memory_space<vmem>>, %arg2: memref<1x128xf32, #tpu.memory_space<vmem>>, %arg3: memref<1x128xf32, #tpu.memory_space<vmem>>, %arg4: memref<1x128xf32, #tpu.memory_space<vmem>>, %arg5: memref<128x128xbf16, #tpu.memory_space<vmem>>, %arg6: memref<1x128xf32, #tpu.memory_space<vmem>>, %arg7: memref<128x128xbf16, #tpu.memory_space<vmem>>, %arg8: memref<1x128xf32, #tpu.memory_space<vmem>>, %arg9: memref<256x128xf32, #tpu.memory_space<vmem>>) attributes {dimension_semantics = [#tpu.dimension_semantics<parallel>], iteration_bounds = array<i64: 1>, scalar_prefetch = 0 : i64, scratch_operands = 0 : i64, tpu.core_type = #tpu.core_type<tc>, window_params = [{transform_indices = @transform_0, window_bounds = array<i64: 256, 128>}, {pipeline_mode = #tpu.pipeline_mode<synchronous>, transform_indices = @transform_1, window_bounds = array<i64: 1, 128>}, {pipeline_mode = #tpu.pipeline_mode<synchronous>, transform_indices = @transform_2, window_bounds = array<i64: 1, 128>}, {pipeline_mode = #tpu.pipeline_mode<synchronous>, transform_indices = @transform_3, window_bounds = array<i64: 1, 128>}, {pipeline_mode = #tpu.pipeline_mode<synchronous>, transform_indices = @transform_4, window_bounds = array<i64: 128, 128>}, {pipeline_mode = #tpu.pipeline_mode<synchronous>, transform_indices = @transform_5, window_bounds = array<i64: 1, 128>}, {pipeline_mode = #tpu.pipeline_mode<synchronous>, transform_indices = @transform_6, window_bounds = array<i64: 128, 128>}, {pipeline_mode = #tpu.pipeline_mode<synchronous>, transform_indices = @transform_7, window_bounds = array<i64: 1, 128>}, {transform_indices = @transform_8, window_bounds = array<i64: 256, 128>}]} {
    %c0 = arith.constant 0 : index
    %c0_0 = arith.constant 0 : index
    %0 = vector.load %arg1[%c0, %c0_0] : memref<256x128xf32, #tpu.memory_space<vmem>>, vector<256x128xf32>
    %c0_1 = arith.constant 0 : index
    %c0_2 = arith.constant 0 : index
    %1 = vector.load %arg2[%c0_1, %c0_2] : memref<1x128xf32, #tpu.memory_space<vmem>>, vector<1x128xf32>
    %c0_3 = arith.constant 0 : index
    %c0_4 = arith.constant 0 : index
    %2 = vector.load %arg3[%c0_3, %c0_4] : memref<1x128xf32, #tpu.memory_space<vmem>>, vector<1x128xf32>
    %c0_5 = arith.constant 0 : index
    %c0_6 = arith.constant 0 : index
    %3 = vector.load %arg4[%c0_5, %c0_6] : memref<1x128xf32, #tpu.memory_space<vmem>>, vector<1x128xf32>
    %cst = arith.constant dense<0.000000e+00> : vector<256xf32>
    %4 = vector.multi_reduction <add>, %0, %cst [1] : vector<256x128xf32> to vector<256xf32>
    %5 = vector.shape_cast %4 : vector<256xf32> to vector<256x1xf32>
    %cst_7 = arith.constant 3.125000e-02 : f32
    %6 = vector.broadcast %cst_7 : f32 to vector<256x1xf32>
    %7 = arith.mulf %5, %6 : vector<256x1xf32>
    %8 = vector.broadcast %7 : vector<256x1xf32> to vector<256x128xf32>
    %9 = arith.subf %0, %8 : vector<256x128xf32>
    %10 = vector.broadcast %1 : vector<1x128xf32> to vector<256x128xf32>
    %11 = arith.mulf %9, %10 : vector<256x128xf32>
    %12 = arith.mulf %11, %11 : vector<256x128xf32>
    %cst_8 = arith.constant dense<0.000000e+00> : vector<256xf32>
    %13 = vector.multi_reduction <add>, %12, %cst_8 [1] : vector<256x128xf32> to vector<256xf32>
    %14 = vector.shape_cast %13 : vector<256xf32> to vector<256x1xf32>
    %cst_9 = arith.constant 3.125000e-02 : f32
    %15 = vector.broadcast %cst_9 : f32 to vector<256x1xf32>
    %16 = arith.mulf %14, %15 : vector<256x1xf32>
    %cst_10 = arith.constant 9.99999997E-7 : f32
    %17 = vector.broadcast %cst_10 : f32 to vector<256x1xf32>
    %18 = arith.addf %16, %17 : vector<256x1xf32>
    %19 = math.rsqrt %18 : vector<256x1xf32>
    %20 = vector.broadcast %19 : vector<256x1xf32> to vector<256x128xf32>
    %21 = arith.mulf %11, %20 : vector<256x128xf32>
    %22 = vector.broadcast %2 : vector<1x128xf32> to vector<256x128xf32>
    %23 = arith.mulf %21, %22 : vector<256x128xf32>
    %24 = vector.broadcast %3 : vector<1x128xf32> to vector<256x128xf32>
    %25 = arith.addf %23, %24 : vector<256x128xf32>
    %26 = arith.truncf %25 : vector<256x128xf32> to vector<256x128xbf16>
    %c0_11 = arith.constant 0 : index
    %c0_12 = arith.constant 0 : index
    %27 = vector.load %arg5[%c0_11, %c0_12] : memref<128x128xbf16, #tpu.memory_space<vmem>>, vector<128x128xbf16>
    %cst_13 = arith.constant dense<0.000000e+00> : vector<256x128xf32>
    %28 = tpu.matmul %26, %27, %cst_13 {dimension_numbers = #tpu.dot_dimension_numbers<[1], [0], [0], [1], [0, 0, 1, 1], [], []>} : vector<256x128xbf16>, vector<128x128xbf16>, vector<256x128xf32> -> vector<256x128xf32>
    %c0_14 = arith.constant 0 : index
    %c0_15 = arith.constant 0 : index
    %29 = vector.load %arg6[%c0_14, %c0_15] : memref<1x128xf32, #tpu.memory_space<vmem>>, vector<1x128xf32>
    %30 = vector.broadcast %29 : vector<1x128xf32> to vector<256x128xf32>
    %31 = arith.addf %28, %30 : vector<256x128xf32>
    %cst_16 = arith.constant 0.000000e+00 : f32
    %32 = vector.broadcast %cst_16 : f32 to vector<256x128xf32>
    %33 = arith.maximumf %31, %32 : vector<256x128xf32>
    %34 = arith.truncf %33 : vector<256x128xf32> to vector<256x128xbf16>
    %c0_17 = arith.constant 0 : index
    %c0_18 = arith.constant 0 : index
    %35 = vector.load %arg7[%c0_17, %c0_18] : memref<128x128xbf16, #tpu.memory_space<vmem>>, vector<128x128xbf16>
    %cst_19 = arith.constant dense<0.000000e+00> : vector<256x128xf32>
    %36 = tpu.matmul %34, %35, %cst_19 {dimension_numbers = #tpu.dot_dimension_numbers<[1], [0], [0], [1], [0, 0, 1, 1], [], []>} : vector<256x128xbf16>, vector<128x128xbf16>, vector<256x128xf32> -> vector<256x128xf32>
    %c0_20 = arith.constant 0 : index
    %c0_21 = arith.constant 0 : index
    %37 = vector.load %arg8[%c0_20, %c0_21] : memref<1x128xf32, #tpu.memory_space<vmem>>, vector<1x128xf32>
    %38 = vector.broadcast %37 : vector<1x128xf32> to vector<256x128xf32>
    %39 = arith.addf %36, %38 : vector<256x128xf32>
    %40 = arith.addf %39, %0 : vector<256x128xf32>
    %c0_22 = arith.constant 0 : index
    %c0_23 = arith.constant 0 : index
    %41 = vector.load %arg9[%c0_22, %c0_23] : memref<256x128xf32, #tpu.memory_space<vmem>>, vector<256x128xf32>
    tpu.vector_store %arg9[%c0_22, %c0_23], %40 {strides = array<i32>} : memref<256x128xf32, #tpu.memory_space<vmem>>, vector<256x128xf32>,
    return
  }
  func.func @transform_0(%arg0: i32) -> (i32, i32) {
    %c0_i32 = arith.constant 0 : i32
    %c0_i32_0 = arith.constant 0 : i32
    return %arg0, %c0_i32 : i32, i32
  }
  func.func @transform_1(%arg0: i32) -> (i32, i32) {
    %c0_i32 = arith.constant 0 : i32
    %c0_i32_0 = arith.constant 0 : i32
    %c0_i32_1 = arith.constant 0 : i32
    return %c0_i32, %c0_i32_0 : i32, i32
  }
  func.func @transform_2(%arg0: i32) -> (i32, i32) {
    %c0_i32 = arith.constant 0 : i32
    %c0_i32_0 = arith.constant 0 : i32
    %c0_i32_1 = arith.constant 0 : i32
    return %c0_i32, %c0_i32_0 : i32, i32
  }
  func.func @transform_3(%arg0: i32) -> (i32, i32) {
    %c0_i32 = arith.constant 0 : i32
    %c0_i32_0 = arith.constant 0 : i32
    %c0_i32_1 = arith.constant 0 : i32
    return %c0_i32, %c0_i32_0 : i32, i32
  }
  func.func @transform_4(%arg0: i32) -> (i32, i32) {
    %c0_i32 = arith.constant 0 : i32
    %c0_i32_0 = arith.constant 0 : i32
    %c0_i32_1 = arith.constant 0 : i32
    return %c0_i32, %c0_i32_0 : i32, i32
  }
  func.func @transform_5(%arg0: i32) -> (i32, i32) {
    %c0_i32 = arith.constant 0 : i32
    %c0_i32_0 = arith.constant 0 : i32
    %c0_i32_1 = arith.constant 0 : i32
    return %c0_i32, %c0_i32_0 : i32, i32
  }
  func.func @transform_6(%arg0: i32) -> (i32, i32) {
    %c0_i32 = arith.constant 0 : i32
    %c0_i32_0 = arith.constant 0 : i32
    %c0_i32_1 = arith.constant 0 : i32
    return %c0_i32, %c0_i32_0 : i32, i32
  }
  func.func @transform_7(%arg0: i32) -> (i32, i32) {
    %c0_i32 = arith.constant 0 : i32
    %c0_i32_0 = arith.constant 0 : i32
    %c0_i32_1 = arith.constant 0 : i32
    return %c0_i32, %c0_i32_0 : i32, i32
  }
  func.func @transform_8(%arg0: i32) -> (i32, i32) {
    %c0_i32 = arith.constant 0 : i32
    %c0_i32_0 = arith.constant 0 : i32
    return %arg0, %c0_i32 : i32, i32
  }
}

</mosaic_0001>

<bundles_post_ra>
// kernel: tpu_custom_call.1
= control target key start
LH: loop header
LB: loop body
LE: loop exit
PB: predicated region body
PF: predicated region fallthrough
CT: control target
= control target key end

     0   :  { %13 = vsyncpa [#allocation3], 0  ;;  %s2148_s0 = inlined_call_operand.hbm [shape: f32[256,128], index: 0, kind: input, shape index: {}]   ;;  %s2149_s1 = inlined_call_operand.vmem [shape: f32[1,128], index: 1, kind: input, shape index: {}]   ;;  %s2150_s2 = inlined_call_operand.vmem [shape: f32[1,128], index: 2, kind: input, shape index: {}]   ;;  %s2151_s3 = inlined_call_operand.vmem [shape: f32[1,128], index: 3, kind: input, shape index: {}]   ;;  %s2152_s4 = inlined_call_operand.hbm [shape: bf16[128,128], index: 4, kind: input, shape index: {}]   ;;  %s2153_s5 = inlined_call_operand.vmem [shape: f32[1,128], index: 5, kind: input, shape index: {}]   ;;  %s2154_s6 = inlined_call_operand.hbm [shape: bf16[128,128], index: 6, kind: input, shape index: {}]   ;;  %s2155_s7 = inlined_call_operand.vmem [shape: f32[1,128], index: 7, kind: input, shape index: {}]   ;;  %s2156_s8 = inlined_call_operand.hbm [shape: f32[256,128], index: 8, kind: output, shape index: {}]  }
   0x1   :  { %14 = vsyncpa [#allocation6], 0 }
   0x2   :  { %15 = vsyncpa [#allocation4], 0  ;;  %s1562_s27 = smov [#allocation5]   ;;  %s1468_s9 = scalar_lea.hbm %s2152_s4, 1024 }
   0x3   :  { %s39_s28 = sshll.u32 %s1562_s27, 4  ;;  %p1469_p0 = scmp.ne.s32.totalorder %s2152_s4, %s1468_s9  ;;  %s40_s28 = int_to_ptr.vmem [resolvable:$true] %s39_s28 }
   0x4   :  { %p1472_p1 = scmp.lt.u32.totalorder %s1468_s9, %s2152_s4 }
   0x6   :  { %p1474_p2 = pnand %p1472_p1, %p1469_p0 }
   0x8   :  { %1477 = shalt.err (!%p1474_p2)
}
   0x9   :  { %s1478_s14 = scalar_lea.vmem %s40_s28, 1024  ;;  %p1483_p4 = scmp.lt.s32.totalorder %s40_s28, %s40_s28 }
   0xa   :  { %p1479_p3 = scmp.ne.s32.totalorder %s40_s28, %s1478_s14  ;;  %p1484_p5 = scmp.lt.s32.totalorder %s1478_s14, %s1478_s14 }
   0xc   :  { %p1485_p6 = por %p1484_p5, %p1483_p4 }
   0xe   :  { %p1486_p7 = pnand %p1485_p6, %p1479_p3 }
  0x10   :  { %1489 = shalt.err (!%p1486_p7)
}
  0x11   :  { %s1563_s15 = smov 64   ;;  %s1564_s16 = smov 4  }
  0x12   :  { %45 = dma.hbm_to_vmem [thread:$0]  %s2152_s4, 1024, %s40_s28, [#allocation6], %s1563_s15, %s1563_s15, %s1564_s16  }
  0x13   :  { %s1565_s19 = smov [#allocation2]   ;;  %s1490_s23 = scalar_lea.hbm %s2148_s0, 4096 }
  0x14   :  { %s21_s20 = sshll.u32 %s1565_s19, 4  ;;  %p1491_p8 = scmp.ne.s32.totalorder %s2148_s0, %s1490_s23  ;;  %s22_s20 = int_to_ptr.vmem [resolvable:$true] %s21_s20 }
  0x15   :  { %p1494_p9 = scmp.lt.u32.totalorder %s1490_s23, %s2148_s0 }
  0x17   :  { %p1496_p10 = pnand %p1494_p9, %p1491_p8 }
  0x19   :  { %1499 = shalt.err (!%p1496_p10)
}
  0x1a   :  { %s1500_s29 = scalar_lea.vmem %s22_s20, 4096  ;;  %p1505_p12 = scmp.lt.s32.totalorder %s22_s20, %s22_s20 }
  0x1b   :  { %p1501_p11 = scmp.ne.s32.totalorder %s22_s20, %s1500_s29  ;;  %p1506_p13 = scmp.lt.s32.totalorder %s1500_s29, %s1500_s29 }
  0x1d   :  { %p1507_p0 = por %p1506_p13, %p1505_p12 }
  0x1f   :  { %p1508_p1 = pnand %p1507_p0, %p1501_p11 }
  0x21   :  { %1511 = shalt.err (!%p1508_p1)
}
  0x22   :  { %s1566_s4 = smov 128   ;;  %s1567_s28 = smov 8  }
  0x23   :  { %27 = dma.hbm_to_vmem [thread:$0]  %s2148_s0, 4096, %s22_s20, [#allocation3], %s1566_s4, %s1566_s4, %s1567_s28  }
  0x24   :  { %s1568_s10 = smov [#allocation7]   ;;  %s1512_s14 = scalar_lea.hbm %s2154_s6, 1024 }
  0x25   :  { %s53_s11 = sshll.u32 %s1568_s10, 4  ;;  %p1513_p2 = scmp.ne.s32.totalorder %s2154_s6, %s1512_s14  ;;  %s54_s11 = int_to_ptr.vmem [resolvable:$true] %s53_s11 }
  0x26   :  { %p1516_p3 = scmp.lt.u32.totalorder %s1512_s14, %s2154_s6 }
  0x28   :  { %p1518_p4 = pnand %p1516_p3, %p1513_p2 }
  0x2a   :  { %1521 = shalt.err (!%p1518_p4)
}
  0x2b   :  { %s1522_s22 = scalar_lea.vmem %s54_s11, 1024  ;;  %p1527_p6 = scmp.lt.s32.totalorder %s54_s11, %s54_s11 }
  0x2c   :  { %p1523_p5 = scmp.ne.s32.totalorder %s54_s11, %s1522_s22  ;;  %p1528_p7 = scmp.lt.s32.totalorder %s1522_s22, %s1522_s22 }
  0x2e   :  { %p1529_p8 = por %p1528_p7, %p1527_p6 }
  0x30   :  { %p1530_p9 = pnand %p1529_p8, %p1523_p5 }
  0x32   :  { %1533 = shalt.err (!%p1530_p9)
}
  0x33   :  { %59 = dma.hbm_to_vmem [thread:$0]  %s2154_s6, 1024, %s54_s11, [#allocation6], %s1563_s15, %s1563_s15, %s1564_s16  }
  0x34   :  { %1556 = dma.done.wait [#allocation3], 4096  }
  0x35   :  { %1557 = vsyncadd [#allocation3], 4294963200 }
  0x36   :  { %1558 = dma.done.wait [#allocation6], 2048  }
  0x37   :  { %1559 = vsyncadd [#allocation6], 4294965248  ;;  %v1660_v0 = vld [vmem:[#allocation2] sm:$0xff]  ;;  %v1662_v1 = vld [vmem:[#allocation2 + $0x10] sm:$0xff] }
  0x38   :  { %107 = vadd.xlane.f32.xlu0 %v1660_v0  ;;  %111 = vadd.xlane.f32.xlu1 %v1662_v1  ;;  %v1666_v2 = vld [vmem:[#allocation2 + $0x8] sm:$0xff]  ;;  %v1668_v3 = vld [vmem:[#allocation2 + $0x18] sm:$0xff]  ;;  %v1672_v4 = vld [vmem:[#allocation2 + $0x20] sm:$0xff] }
  0x39   :  { %v1674_v5 = vld [vmem:[#allocation2 + $0x28] sm:$0xff]  ;;  %v1678_v6 = vld [vmem:[#allocation2 + $0x30] sm:$0xff]  ;;  %v1680_v7 = vld [vmem:[#allocation2 + $0x38] sm:$0xff] }
  0x3a   :  { %v1682_v8 = vld [vmem:[#allocation2 + $0x40] sm:$0xff]  ;;  %v1684_v9 = vld [vmem:[#allocation2 + $0x48] sm:$0xff]  ;;  %v1688_v10 = vld [vmem:[#allocation2 + $0x50] sm:$0xff] }
  0x3b   :  { %v1692_v11 = vld [vmem:[#allocation2 + $0x58] sm:$0xff]  ;;  %v1696_v12 = vld [vmem:[#allocation2 + $0x60] sm:$0xff]  ;;  %v1698_v13 = vld [vmem:[#allocation2 + $0x68] sm:$0xff] }
  0x3c   :  { %109 = vadd.xlane.f32.xlu0 %v1666_v2  ;;  %113 = vadd.xlane.f32.xlu1 %v1668_v3  ;;  %v1702_v14 = vld [vmem:[#allocation2 + $0x70] sm:$0xff]  ;;  %v1704_v15 = vld [vmem:[#allocation2 + $0x78] sm:$0xff]  ;;  %v1708_v16 = vld [vmem:[#allocation2 + $0x80] sm:$0xff] }
  0x3d   :  { %v1710_v17 = vld [vmem:[#allocation2 + $0x88] sm:$0xff]  ;;  %v1714_v18 = vld [vmem:[#allocation2 + $0x90] sm:$0xff]  ;;  %v1716_v19 = vld [vmem:[#allocation2 + $0x98] sm:$0xff] }
  0x3e   :  { %v1720_v20 = vld [vmem:[#allocation2 + $0xa0] sm:$0xff]  ;;  %v1722_v21 = vld [vmem:[#allocation2 + $0xa8] sm:$0xff]  ;;  %v1726_v22 = vld [vmem:[#allocation2 + $0xb0] sm:$0xff] }
  0x3f   :  { %v1728_v23 = vld [vmem:[#allocation2 + $0xb8] sm:$0xff]  ;;  %v1732_v24 = vld [vmem:[#allocation2 + $0xc0] sm:$0xff]  ;;  %v1734_v25 = vld [vmem:[#allocation2 + $0xc8] sm:$0xff] }
  0x40   :  { %115 = vadd.xlane.f32.xlu0 %v1672_v4  ;;  %117 = vadd.xlane.f32.xlu1 %v1674_v5  ;;  %v1738_v26 = vld [vmem:[#allocation2 + $0xd0] sm:$0xff]  ;;  %v1740_v27 = vld [vmem:[#allocation2 + $0xd8] sm:$0xff]  ;;  %v1744_v28 = vld [vmem:[#allocation2 + $0xe0] sm:$0xff] }
  0x41   :  { %v1746_v29 = vld [vmem:[#allocation2 + $0xe8] sm:$0xff]  ;;  %v1750_v30 = vld [vmem:[#allocation2 + $0xf0] sm:$0xff]  ;;  %v1752_v31 = vld [vmem:[#allocation2 + $0xf8] sm:$0xff] }
  0x42   :  { %v1356_v32 = vld [vmem:[#allocation5] sm:$0xff]  }
  0x43   :  { %1252 = vmatprep.subr.bf16.mxu0 %v1356_v32  ;;  %v1759_v37 = vld [vmem:[%s2149_s1] ss:$0 sm:$0xff] }
  0x44   :  { %119 = vadd.xlane.f32.xlu0 %v1678_v6  ;;  %121 = vadd.xlane.f32.xlu1 %v1680_v7 }
  0x45   :  { %1253 = vmatpush3.bf16.msra.mxu0 %v1356_v32 }
  0x48   :  { %123 = vadd.xlane.f32.xlu0 %v1682_v8  ;;  %125 = vadd.xlane.f32.xlu1 %v1684_v9 }
  0x4c   :  { %127 = vadd.xlane.f32.xlu0 %v1688_v10  ;;  %129 = vadd.xlane.f32.xlu1 %v1692_v11 }
  0x50   :  { %131 = vadd.xlane.f32.xlu0 %v1696_v12  ;;  %133 = vadd.xlane.f32.xlu1 %v1698_v13 }
  0x54   :  { %135 = vadd.xlane.f32.xlu0 %v1702_v14  ;;  %137 = vadd.xlane.f32.xlu1 %v1704_v15 }
  0x58   :  { %139 = vadd.xlane.f32.xlu0 %v1708_v16  ;;  %141 = vadd.xlane.f32.xlu1 %v1710_v17 }
  0x5c   :  { %143 = vadd.xlane.f32.xlu0 %v1714_v18  ;;  %145 = vadd.xlane.f32.xlu1 %v1716_v19 }
  0x60   :  { %147 = vadd.xlane.f32.xlu0 %v1720_v20  ;;  %149 = vadd.xlane.f32.xlu1 %v1722_v21 }
  0x64   :  { %151 = vadd.xlane.f32.xlu0 %v1726_v22  ;;  %153 = vadd.xlane.f32.xlu1 %v1728_v23 }
  0x68   :  { %155 = vadd.xlane.f32.xlu0 %v1732_v24  ;;  %157 = vadd.xlane.f32.xlu1 %v1734_v25 }
  0x6c   :  { %159 = vadd.xlane.f32.xlu0 %v1738_v26  ;;  %161 = vadd.xlane.f32.xlu1 %v1740_v27 }
  0x70   :  { %163 = vadd.xlane.f32.xlu0 %v1744_v28  ;;  %165 = vadd.xlane.f32.xlu1 %v1746_v29 }
  0x74   :  { %167 = vadd.xlane.f32.xlu0 %v1750_v30  ;;  %169 = vadd.xlane.f32.xlu1 %v1752_v31 }
  0xc5   :  { %v108_v33 = vpop.xlane.xlu0 %107  ;;  %v112_v34 = vpop.xlane.xlu1 %111 }
  0xc6   :  { %v171_v35 = vmul.f32 0.03125, %v108_v33  ;;  %v173_v36 = vmul.f32 0.03125, %v112_v34 }
  0xc8   :  { %v203_v38 = vsub.f32 %v1660_v0, %v171_v35  ;;  %v205_v39 = vsub.f32 %v1662_v1, %v173_v36 }
  0xc9   :  { %v110_v40 = vpop.xlane.xlu0 %109  ;;  %v114_v41 = vpop.xlane.xlu1 %113 }
  0xca   :  { %v172_v42 = vmul.f32 0.03125, %v110_v40  ;;  %v174_v43 = vmul.f32 0.03125, %v114_v41  ;;  %v1764_v44 = vmul.f32 %v1759_v37, %v203_v38  ;;  %v1767_v45 = vmul.f32 %v1759_v37, %v205_v39 }
  0xcc   :  { %v204_v46 = vsub.f32 %v1666_v2, %v172_v42  ;;  %v206_v47 = vsub.f32 %v1668_v3, %v174_v43  ;;  %v273_v48 = vmul.f32 %v1764_v44, %v1764_v44  ;;  %v275_v51 = vmul.f32 %v1767_v45, %v1767_v45 }
  0xcd   :  { %v116_v49 = vpop.xlane.xlu0 %115  ;;  %v118_v50 = vpop.xlane.xlu1 %117 }
  0xce   :  { %v175_v52 = vmul.f32 0.03125, %v116_v49  ;;  %305 = vadd.xlane.f32.xlu0 %v273_v48  ;;  %v176_v53 = vmul.f32 0.03125, %v118_v50  ;;  %v1776_v54 = vmul.f32 %v1759_v37, %v204_v46  ;;  %v1779_v55 = vmul.f32 %v1759_v37, %v206_v47 }
  0xd0   :  { %v207_v56 = vsub.f32 %v1672_v4, %v175_v52  ;;  %v208_v57 = vsub.f32 %v1674_v5, %v176_v53  ;;  %v274_v58 = vmul.f32 %v1776_v54, %v1776_v54  ;;  %v276_v61 = vmul.f32 %v1779_v55, %v1779_v55  ;;  %v1357_v53 = vld [vmem:[#allocation5 + $0x8] sm:$0xff]  }
  0xd1   :  { %v120_v59 = vpop.xlane.xlu0 %119  ;;  %v122_v60 = vpop.xlane.xlu1 %121  ;;  %1254 = vmatprep.subr.bf16.mxu0 %v1357_v53 }
  0xd2   :  { %v177_v62 = vmul.f32 0.03125, %v120_v59  ;;  %309 = vadd.xlane.f32.xlu0 %v275_v51  ;;  %307 = vadd.xlane.f32.xlu1 %v274_v58  ;;  %v178_v63 = vmul.f32 0.03125, %v122_v60  ;;  %v1788_v0 = vmul.f32 %v1759_v37, %v207_v56  ;;  %v1791_v1 = vmul.f32 %v1759_v37, %v208_v57 }
  0xd3   :  { %1255 = vmatpush3.bf16.msra.mxu0 %v1357_v53 }
  0xd4   :  { %v209_v2 = vsub.f32 %v1678_v6, %v177_v62  ;;  %v210_v3 = vsub.f32 %v1680_v7, %v178_v63  ;;  %v277_v4 = vmul.f32 %v1788_v0, %v1788_v0  ;;  %v278_v33 = vmul.f32 %v1791_v1, %v1791_v1 }
  0xd5   :  { %v124_v5 = vpop.xlane.xlu0 %123  ;;  %v126_v32 = vpop.xlane.xlu1 %125 }
  0xd6   :  { %v179_v34 = vmul.f32 0.03125, %v124_v5  ;;  %311 = vadd.xlane.f32.xlu1 %v276_v61  ;;  %313 = vadd.xlane.f32.xlu0 %v277_v4  ;;  %v180_v35 = vmul.f32 0.03125, %v126_v32  ;;  %v1800_v36 = vmul.f32 %v1759_v37, %v209_v2  ;;  %v1803_v38 = vmul.f32 %v1759_v37, %v210_v3 }
  0xd8   :  { %v211_v6 = vsub.f32 %v1682_v8, %v179_v34  ;;  %v212_v7 = vsub.f32 %v1684_v9, %v180_v35  ;;  %v279_v39 = vmul.f32 %v1800_v36, %v1800_v36  ;;  %v280_v42 = vmul.f32 %v1803_v38, %v1803_v38 }
  0xd9   :  { %v128_v40 = vpop.xlane.xlu0 %127  ;;  %v130_v41 = vpop.xlane.xlu1 %129 }
  0xda   :  { %v181_v43 = vmul.f32 0.03125, %v128_v40  ;;  %315 = vadd.xlane.f32.xlu1 %v278_v33  ;;  %317 = vadd.xlane.f32.xlu0 %v279_v39  ;;  %v182_v46 = vmul.f32 0.03125, %v130_v41  ;;  %v1812_v47 = vmul.f32 %v1759_v37, %v211_v6  ;;  %v1815_v48 = vmul.f32 %v1759_v37, %v212_v7 }
  0xdc   :  { %v213_v8 = vsub.f32 %v1688_v10, %v181_v43  ;;  %v214_v9 = vsub.f32 %v1692_v11, %v182_v46  ;;  %v281_v49 = vmul.f32 %v1812_v47, %v1812_v47  ;;  %v282_v52 = vmul.f32 %v1815_v48, %v1815_v48 }
  0xdd   :  { %v132_v50 = vpop.xlane.xlu0 %131  ;;  %v134_v51 = vpop.xlane.xlu1 %133 }
  0xde   :  { %v183_v56 = vmul.f32 0.03125, %v132_v50  ;;  %319 = vadd.xlane.f32.xlu1 %v280_v42  ;;  %321 = vadd.xlane.f32.xlu0 %v281_v49  ;;  %v184_v57 = vmul.f32 0.03125, %v134_v51  ;;  %v1824_v58 = vmul.f32 %v1759_v37, %v213_v8  ;;  %v1827_v10 = vmul.f32 %v1759_v37, %v214_v9 }
  0xe0   :  { %v215_v11 = vsub.f32 %v1696_v12, %v183_v56  ;;  %v216_v59 = vsub.f32 %v1698_v13, %v184_v57  ;;  %v283_v60 = vmul.f32 %v1824_v58, %v1824_v58  ;;  %v284_v63 = vmul.f32 %v1827_v10, %v1827_v10  ;;  %v1358_v13 = vld [vmem:[#allocation5 + $0x10] sm:$0xff]  }
  0xe1   :  { %v136_v61 = vpop.xlane.xlu0 %135  ;;  %v138_v62 = vpop.xlane.xlu1 %137  ;;  %1256 = vmatprep.subr.bf16.mxu0 %v1358_v13 }
  0xe2   :  { %v185_v2 = vmul.f32 0.03125, %v136_v61  ;;  %323 = vadd.xlane.f32.xlu1 %v282_v52  ;;  %325 = vadd.xlane.f32.xlu0 %v283_v60  ;;  %v186_v3 = vmul.f32 0.03125, %v138_v62  ;;  %v1836_v4 = vmul.f32 %v1759_v37, %v215_v11  ;;  %v1839_v12 = vmul.f32 %v1759_v37, %v216_v59 }
  0xe3   :  { %1257 = vmatpush3.bf16.msra.mxu0 %v1358_v13 }
  0xe4   :  { %v217_v5 = vsub.f32 %v1702_v14, %v185_v2  ;;  %v218_v32 = vsub.f32 %v1704_v15, %v186_v3  ;;  %v285_v33 = vmul.f32 %v1836_v4, %v1836_v4  ;;  %v286_v6 = vmul.f32 %v1839_v12, %v1839_v12  ;;  %v1359_v15 = vld [vmem:[#allocation5 + $0x18] sm:$0xff]  }
  0xe5   :  { %v140_v34 = vpop.xlane.xlu0 %139  ;;  %v142_v35 = vpop.xlane.xlu1 %141  ;;  %1258 = vmatprep.subr.bf16.mxu0 %v1359_v15 }
  0xe6   :  { %v187_v7 = vmul.f32 0.03125, %v140_v34  ;;  %327 = vadd.xlane.f32.xlu1 %v284_v63  ;;  %329 = vadd.xlane.f32.xlu0 %v285_v33  ;;  %v188_v39 = vmul.f32 0.03125, %v142_v35  ;;  %v1848_v40 = vmul.f32 %v1759_v37, %v217_v5  ;;  %v1851_v14 = vmul.f32 %v1759_v37, %v218_v32 }
  0xe7   :  { %1259 = vmatpush3.bf16.msra.mxu0 %v1359_v15 }
  0xe8   :  { %v219_v41 = vsub.f32 %v1708_v16, %v187_v7  ;;  %v220_v42 = vsub.f32 %v1710_v17, %v188_v39  ;;  %v287_v43 = vmul.f32 %v1848_v40, %v1848_v40  ;;  %v288_v9 = vmul.f32 %v1851_v14, %v1851_v14  ;;  %v1360_v17 = vld [vmem:[#allocation5 + $0x20] sm:$0xff]  }
  0xe9   :  { %v144_v46 = vpop.xlane.xlu0 %143  ;;  %v146_v8 = vpop.xlane.xlu1 %145  ;;  %1260 = vmatprep.subr.bf16.mxu0 %v1360_v17 }
  0xea   :  { %v189_v49 = vmul.f32 0.03125, %v144_v46  ;;  %331 = vadd.xlane.f32.xlu1 %v286_v6  ;;  %333 = vadd.xlane.f32.xlu0 %v287_v43  ;;  %v190_v50 = vmul.f32 0.03125, %v146_v8  ;;  %v1860_v51 = vmul.f32 %v1759_v37, %v219_v41  ;;  %v1863_v16 = vmul.f32 %v1759_v37, %v220_v42 }
  0xeb   :  { %1261 = vmatpush3.bf16.msra.mxu0 %v1360_v17 }
  0xec   :  { %v221_v52 = vsub.f32 %v1714_v18, %v189_v49  ;;  %v222_v53 = vsub.f32 %v1716_v19, %v190_v50  ;;  %v289_v56 = vmul.f32 %v1860_v51, %v1860_v51  ;;  %v290_v59 = vmul.f32 %v1863_v16, %v1863_v16  ;;  %v1361_v19 = vld [vmem:[#allocation5 + $0x28] sm:$0xff]  }
  0xed   :  { %v148_v57 = vpop.xlane.xlu0 %147  ;;  %v150_v11 = vpop.xlane.xlu1 %149  ;;  %1262 = vmatprep.subr.bf16.mxu0 %v1361_v19 }
  0xee   :  { %v191_v60 = vmul.f32 0.03125, %v148_v57  ;;  %335 = vadd.xlane.f32.xlu1 %v288_v9  ;;  %337 = vadd.xlane.f32.xlu0 %v289_v56  ;;  %v192_v61 = vmul.f32 0.03125, %v150_v11  ;;  %v1872_v62 = vmul.f32 %v1759_v37, %v221_v52  ;;  %v1875_v18 = vmul.f32 %v1759_v37, %v222_v53 }
  0xef   :  { %1263 = vmatpush3.bf16.msra.mxu0 %v1361_v19 }
  0xf0   :  { %v223_v63 = vsub.f32 %v1720_v20, %v191_v60  ;;  %v224_v2 = vsub.f32 %v1722_v21, %v192_v61  ;;  %v291_v3 = vmul.f32 %v1872_v62, %v1872_v62  ;;  %v292_v32 = vmul.f32 %v1875_v18, %v1875_v18  ;;  %v1362_v21 = vld [vmem:[#allocation5 + $0x30] sm:$0xff]  }
  0xf1   :  { %v152_v13 = vpop.xlane.xlu0 %151  ;;  %v154_v5 = vpop.xlane.xlu1 %153  ;;  %1264 = vmatprep.subr.bf16.mxu0 %v1362_v21 }
  0xf2   :  { %v193_v33 = vmul.f32 0.03125, %v152_v13  ;;  %339 = vadd.xlane.f32.xlu1 %v290_v59  ;;  %341 = vadd.xlane.f32.xlu0 %v291_v3  ;;  %v194_v34 = vmul.f32 0.03125, %v154_v5  ;;  %v1884_v35 = vmul.f32 %v1759_v37, %v223_v63  ;;  %v1887_v20 = vmul.f32 %v1759_v37, %v224_v2 }
  0xf3   :  { %1265 = vmatpush3.bf16.msra.mxu0 %v1362_v21 }
  0xf4   :  { %v225_v6 = vsub.f32 %v1726_v22, %v193_v33  ;;  %v226_v7 = vsub.f32 %v1728_v23, %v194_v34  ;;  %v293_v39 = vmul.f32 %v1884_v35, %v1884_v35  ;;  %v294_v42 = vmul.f32 %v1887_v20, %v1887_v20  ;;  %v1363_v23 = vld [vmem:[#allocation5 + $0x38] sm:$0xff]  }
  0xf5   :  { %v156_v15 = vpop.xlane.xlu0 %155  ;;  %v158_v41 = vpop.xlane.xlu1 %157  ;;  %1266 = vmatprep.subr.bf16.mxu0 %v1363_v23 }
  0xf6   :  { %v195_v43 = vmul.f32 0.03125, %v156_v15  ;;  %343 = vadd.xlane.f32.xlu1 %v292_v32  ;;  %345 = vadd.xlane.f32.xlu0 %v293_v39  ;;  %v196_v46 = vmul.f32 0.03125, %v158_v41  ;;  %v1896_v8 = vmul.f32 %v1759_v37, %v225_v6  ;;  %v1899_v22 = vmul.f32 %v1759_v37, %v226_v7 }
  0xf7   :  { %1267 = vmatpush3.bf16.msra.mxu0 %v1363_v23 }
  0xf8   :  { %v227_v9 = vsub.f32 %v1732_v24, %v195_v43  ;;  %v228_v49 = vsub.f32 %v1734_v25, %v196_v46  ;;  %v295_v50 = vmul.f32 %v1896_v8, %v1896_v8  ;;  %v296_v53 = vmul.f32 %v1899_v22, %v1899_v22 }
  0xf9   :  { %v160_v17 = vpop.xlane.xlu0 %159  ;;  %v162_v52 = vpop.xlane.xlu1 %161 }
  0xfa   :  { %v197_v56 = vmul.f32 0.03125, %v160_v17  ;;  %347 = vadd.xlane.f32.xlu1 %v294_v42  ;;  %349 = vadd.xlane.f32.xlu0 %v295_v50  ;;  %v198_v57 = vmul.f32 0.03125, %v162_v52  ;;  %v1908_v11 = vmul.f32 %v1759_v37, %v227_v9  ;;  %v1911_v24 = vmul.f32 %v1759_v37, %v228_v49  ;;  %v1365_v9 = vld [vmem:[#allocation7 + $0x8] sm:$0xff]   ;;  %v1366_v49 = vld [vmem:[#allocation7 + $0x10] sm:$0xff]   ;;  %v1367_v50 = vld [vmem:[#allocation7 + $0x18] sm:$0xff]  }
  0xfb   :  { %v1369_v17 = vld [vmem:[#allocation7 + $0x28] sm:$0xff]  }
  0xfc   :  { %v229_v25 = vsub.f32 %v1738_v26, %v197_v56  ;;  %v230_v59 = vsub.f32 %v1740_v27, %v198_v57  ;;  %v297_v60 = vmul.f32 %v1908_v11, %v1908_v11  ;;  %v298_v63 = vmul.f32 %v1911_v24, %v1911_v24 }
  0xfd   :  { %v164_v61 = vpop.xlane.xlu0 %163  ;;  %v166_v19 = vpop.xlane.xlu1 %165 }
  0xfe   :  { %v199_v2 = vmul.f32 0.03125, %v164_v61  ;;  %351 = vadd.xlane.f32.xlu1 %v296_v53  ;;  %353 = vadd.xlane.f32.xlu0 %v297_v60  ;;  %v200_v3 = vmul.f32 0.03125, %v166_v19  ;;  %v1920_v13 = vmul.f32 %v1759_v37, %v229_v25  ;;  %v1923_v5 = vmul.f32 %v1759_v37, %v230_v59 }
 0x100   :  { %v231_v26 = vsub.f32 %v1744_v28, %v199_v2  ;;  %v232_v27 = vsub.f32 %v1746_v29, %v200_v3  ;;  %v299_v32 = vmul.f32 %v1920_v13, %v1920_v13  ;;  %v300_v21 = vmul.f32 %v1923_v5, %v1923_v5 }
 0x101   :  { %v168_v33 = vpop.xlane.xlu0 %167  ;;  %v170_v34 = vpop.xlane.xlu1 %169 }
 0x102   :  { %v201_v6 = vmul.f32 0.03125, %v168_v33  ;;  %355 = vadd.xlane.f32.xlu1 %v298_v63  ;;  %357 = vadd.xlane.f32.xlu0 %v299_v32  ;;  %v202_v7 = vmul.f32 0.03125, %v170_v34  ;;  %v1932_v39 = vmul.f32 %v1759_v37, %v231_v26  ;;  %v1935_v15 = vmul.f32 %v1759_v37, %v232_v27 }
 0x104   :  { %v233_v28 = vsub.f32 %v1750_v30, %v201_v6  ;;  %v234_v29 = vsub.f32 %v1752_v31, %v202_v7  ;;  %v301_v41 = vmul.f32 %v1932_v39, %v1932_v39  ;;  %v302_v42 = vmul.f32 %v1935_v15, %v1935_v15  ;;  %v1364_v31 = vld [vmem:[#allocation7] sm:$0xff]  }
 0x105   :  { %1300 = vmatprep.subr.bf16.mxu1 %v1364_v31 }
 0x106   :  { %359 = vadd.xlane.f32.xlu1 %v300_v21  ;;  %361 = vadd.xlane.f32.xlu0 %v301_v41  ;;  %v1944_v43 = vmul.f32 %v1759_v37, %v233_v28  ;;  %v1947_v46 = vmul.f32 %v1759_v37, %v234_v29  ;;  %v1368_v37 = vld [vmem:[#allocation7 + $0x20] sm:$0xff]  }
 0x107   :  { %1301 = vmatpush3.bf16.msra.mxu1 %v1364_v31 }
 0x108   :  { %v303_v23 = vmul.f32 %v1944_v43, %v1944_v43  ;;  %v304_v30 = vmul.f32 %v1947_v46, %v1947_v46  ;;  %1302 = vmatprep.subr.bf16.mxu1 %v1365_v9 }
 0x10a   :  { %363 = vadd.xlane.f32.xlu1 %v302_v42  ;;  %365 = vadd.xlane.f32.xlu0 %v303_v23 }
 0x10b   :  { %1303 = vmatpush3.bf16.msra.mxu1 %v1365_v9  ;;  %v1957_v9 = vld [vmem:[%s2150_s2] ss:$0 sm:$0xff] }
 0x10c   :  { %1304 = vmatprep.subr.bf16.mxu1 %v1366_v49 }
 0x10e   :  { %367 = vadd.xlane.f32.xlu1 %v304_v30 }
 0x10f   :  { %1305 = vmatpush3.bf16.msra.mxu1 %v1366_v49 }
 0x110   :  { %1306 = vmatprep.subr.bf16.mxu1 %v1367_v50 }
 0x113   :  { %1307 = vmatpush3.bf16.msra.mxu1 %v1367_v50 }
 0x114   :  { %1308 = vmatprep.subr.bf16.mxu1 %v1368_v37 }
 0x117   :  { %1309 = vmatpush3.bf16.msra.mxu1 %v1368_v37 }
 0x118   :  { %1310 = vmatprep.subr.bf16.mxu1 %v1369_v17 }
 0x11b   :  { %1311 = vmatpush3.bf16.msra.mxu1 %v1369_v17 }
 0x15b   :  { %v306_v52 = vpop.xlane.xlu0 %305 }
 0x15c   :  { %v369_v53 = vmul.f32 0.03125, %v306_v52 }
 0x15e   :  { %v401_v56 = vadd.f32 1e-06, %v369_v53 }
 0x15f   :  { %v308_v57 = vpop.xlane.xlu1 %307  ;;  %v310_v25 = vpop.xlane.xlu0 %309 }
 0x160   :  { %1372 = vrsqrt.f32 %v401_v56  ;;  %v370_v59 = vmul.f32 0.03125, %v308_v57  ;;  %v371_v60 = vmul.f32 0.03125, %v310_v25 }
 0x162   :  { %v402_v61 = vadd.f32 1e-06, %v370_v59  ;;  %v403_v19 = vadd.f32 1e-06, %v371_v60  ;;  %v1964_v59 = vld [vmem:[%s2151_s3] ss:$0 sm:$0xff] }
 0x163   :  { %v312_v63 = vpop.xlane.xlu1 %311  ;;  %v314_v2 = vpop.xlane.xlu0 %313 }
 0x164   :  { %1374 = vrsqrt.f32 %v402_v61  ;;  %v372_v3 = vmul.f32 0.03125, %v312_v63  ;;  %v373_v26 = vmul.f32 0.03125, %v314_v2 }
 0x165   :  { %1376 = vrsqrt.f32 %v403_v19 }
 0x166   :  { %v404_v27 = vadd.f32 1e-06, %v372_v3  ;;  %v405_v32 = vadd.f32 1e-06, %v373_v26 }
 0x167   :  { %v316_v33 = vpop.xlane.xlu1 %315  ;;  %v318_v34 = vpop.xlane.xlu0 %317 }
 0x168   :  { %1378 = vrsqrt.f32 %v404_v27  ;;  %v374_v21 = vmul.f32 0.03125, %v316_v33  ;;  %v375_v6 = vmul.f32 0.03125, %v318_v34 }
 0x169   :  { %1380 = vrsqrt.f32 %v405_v32 }
 0x16a   :  { %v1373_v7 = vpop.eup %1372  ;;  %v406_v28 = vadd.f32 1e-06, %v374_v21  ;;  %v407_v29 = vadd.f32 1e-06, %v375_v6 }
 0x16b   :  { %v320_v41 = vpop.xlane.xlu1 %319  ;;  %v322_v42 = vpop.xlane.xlu0 %321  ;;  %v465_v23 = vmul.f32 %v1373_v7, %v1764_v44 }
 0x16c   :  { %1382 = vrsqrt.f32 %v406_v28  ;;  %v376_v30 = vmul.f32 0.03125, %v320_v41  ;;  %v377_v31 = vmul.f32 0.03125, %v322_v42 }
 0x16d   :  { %1384 = vrsqrt.f32 %v407_v29  ;;  %v503_v57 = vmul.f32 %v1957_v9, %v465_v23 }
 0x16e   :  { %v1375_v49 = vpop.eup %1374  ;;  %v408_v50 = vadd.f32 1e-06, %v376_v30  ;;  %v409_v37 = vadd.f32 1e-06, %v377_v31 }
 0x16f   :  { %v1377_v17 = vpop.eup %1376  ;;  %v324_v52 = vpop.xlane.xlu1 %323  ;;  %v466_v56 = vmul.f32 %v1375_v49, %v1776_v54  ;;  %v541_v27 = vadd.f32 %v1964_v59, %v503_v57 }
 0x170   :  { %v326_v53 = vpop.xlane.xlu0 %325  ;;  %1386 = vrsqrt.f32 %v408_v50  ;;  %v378_v44 = vmul.f32 0.03125, %v324_v52  ;;  %v467_v60 = vmul.f32 %v1377_v17, %v1767_v45 }
 0x171   :  { %v379_v25 = vmul.f32 0.03125, %v326_v53  ;;  %1388 = vrsqrt.f32 %v409_v37  ;;  %v504_v61 = vmul.f32 %v1957_v9, %v466_v56 }
 0x172   :  { %v1379_v19 = vpop.eup %1378  ;;  %v410_v63 = vadd.f32 1e-06, %v378_v44  ;;  %v505_v34 = vmul.f32 %v1957_v9, %v467_v60 }
 0x173   :  { %v411_v2 = vadd.f32 1e-06, %v379_v25  ;;  %v1381_v3 = vpop.eup %1380  ;;  %v328_v54 = vpop.xlane.xlu1 %327  ;;  %v542_v32 = vadd.f32 %v1964_v59, %v504_v61  ;;  %v468_v33 = vmul.f32 %v1379_v19, %v1779_v55 }
 0x174   :  { %v330_v26 = vpop.xlane.xlu0 %329  ;;  %1390 = vrsqrt.f32 %v410_v63  ;;  %v380_v21 = vmul.f32 0.03125, %v328_v54  ;;  %v469_v28 = vmul.f32 %v1381_v3, %v1788_v0  ;;  %v543_v55 = vadd.f32 %v1964_v59, %v505_v34 }
 0x175   :  { %v381_v45 = vmul.f32 0.03125, %v330_v26  ;;  %1392 = vrsqrt.f32 %v411_v2  ;;  %v573_v6 = vpack.c.bf16 %v542_v32, %v541_v27  ;;  %v506_v7 = vmul.f32 %v1957_v9, %v468_v33 }
 0x176   :  { %v1383_v29 = vpop.eup %1382  ;;  %v412_v41 = vadd.f32 1e-06, %v380_v21  ;;  %v507_v37 = vmul.f32 %v1957_v9, %v469_v28 }
 0x177   :  { %v413_v42 = vadd.f32 1e-06, %v381_v45  ;;  %v1385_v23 = vpop.eup %1384  ;;  %v332_v30 = vpop.xlane.xlu1 %331  ;;  %1268 = vmatprep.mubr.bf16.mxu0 %v573_v6  ;;  %v544_v49 = vadd.f32 %v1964_v59, %v506_v7  ;;  %v470_v50 = vmul.f32 %v1383_v29, %v1791_v1 }
 0x178   :  { %v334_v31 = vpop.xlane.xlu0 %333  ;;  %1394 = vrsqrt.f32 %v412_v41  ;;  %v382_v17 = vmul.f32 0.03125, %v332_v30  ;;  %v471_v0 = vmul.f32 %v1385_v23, %v1800_v36  ;;  %v545_v1 = vadd.f32 %v1964_v59, %v507_v37 }
 0x179   :  { %v383_v52 = vmul.f32 0.03125, %v334_v31  ;;  %1396 = vrsqrt.f32 %v413_v42  ;;  %v574_v53 = vpack.c.bf16 %v544_v49, %v543_v55  ;;  %v508_v56 = vmul.f32 %v1957_v9, %v470_v50 }
 0x17a   :  { %v1387_v57 = vpop.eup %1386  ;;  %v414_v44 = vadd.f32 1e-06, %v382_v17  ;;  %v509_v3 = vmul.f32 %v1957_v9, %v471_v0 }
 0x17b   :  { %v415_v25 = vadd.f32 1e-06, %v383_v52  ;;  %v1389_v60 = vpop.eup %1388  ;;  %v336_v61 = vpop.xlane.xlu1 %335  ;;  %1269 = vmatmul.mubr.bf16.vlgmr.msra.gmra.mrb[0].mxu0 %v574_v53  ;;  %v546_v63 = vadd.f32 %v1964_v59, %v508_v56  ;;  %v472_v2 = vmul.f32 %v1387_v57, %v1803_v38 }
 0x17c   :  { %v338_v19 = vpop.xlane.xlu0 %337  ;;  %1398 = vrsqrt.f32 %v414_v44  ;;  %v384_v36 = vmul.f32 0.03125, %v336_v61  ;;  %v473_v32 = vmul.f32 %v1389_v60, %v1812_v47  ;;  %v547_v38 = vadd.f32 %v1964_v59, %v509_v3 }
 0x17d   :  { %v385_v54 = vmul.f32 0.03125, %v338_v19  ;;  %1400 = vrsqrt.f32 %v415_v25  ;;  %v575_v26 = vpack.c.bf16 %v546_v63, %v545_v1  ;;  %v510_v27 = vmul.f32 %v1957_v9, %v472_v2 }
 0x17e   :  { %v1391_v33 = vpop.eup %1390  ;;  %v416_v34 = vadd.f32 1e-06, %v384_v36  ;;  %v511_v41 = vmul.f32 %v1957_v9, %v473_v32 }
 0x17f   :  { %v417_v21 = vadd.f32 1e-06, %v385_v54  ;;  %v1393_v45 = vpop.eup %1392  ;;  %v340_v6 = vpop.xlane.xlu1 %339  ;;  %1272 = vmatprep.mubr.bf16.mxu0 %v575_v26  ;;  %v548_v28 = vadd.f32 %v1964_v59, %v510_v27  ;;  %v474_v29 = vmul.f32 %v1391_v33, %v1815_v48 }
 0x180   :  { %v342_v7 = vpop.xlane.xlu0 %341  ;;  %1402 = vrsqrt.f32 %v416_v34  ;;  %v386_v42 = vmul.f32 0.03125, %v340_v6  ;;  %v475_v47 = vmul.f32 %v1393_v45, %v1824_v58  ;;  %v549_v48 = vadd.f32 %v1964_v59, %v511_v41 }
 0x181   :  { %v387_v23 = vmul.f32 0.03125, %v342_v7  ;;  %1404 = vrsqrt.f32 %v417_v21  ;;  %v576_v30 = vpack.c.bf16 %v548_v28, %v547_v38  ;;  %v512_v31 = vmul.f32 %v1957_v9, %v474_v29 }
 0x182   :  { %v1395_v55 = vpop.eup %1394  ;;  %v418_v49 = vadd.f32 1e-06, %v386_v42  ;;  %v513_v56 = vmul.f32 %v1957_v9, %v475_v47 }
 0x183   :  { %v419_v50 = vadd.f32 1e-06, %v387_v23  ;;  %v1397_v37 = vpop.eup %1396  ;;  %v344_v17 = vpop.xlane.xlu1 %343  ;;  %1273 = vmatmul.mubr.bf16.gmra.mrb[4].mxu0 %v576_v30  ;;  %v550_v0 = vadd.f32 %v1964_v59, %v512_v31  ;;  %v476_v53 = vmul.f32 %v1395_v55, %v1827_v10 }
 0x184   :  { %v346_v52 = vpop.xlane.xlu0 %345  ;;  %1406 = vrsqrt.f32 %v418_v49  ;;  %v388_v58 = vmul.f32 0.03125, %v344_v17  ;;  %v477_v60 = vmul.f32 %v1397_v37, %v1836_v4  ;;  %v551_v10 = vadd.f32 %v1964_v59, %v513_v56 }
 0x185   :  { %v389_v57 = vmul.f32 0.03125, %v346_v52  ;;  %1408 = vrsqrt.f32 %v419_v50  ;;  %v577_v44 = vpack.c.bf16 %v550_v0, %v549_v48  ;;  %v514_v25 = vmul.f32 %v1957_v9, %v476_v53 }
 0x186   :  { %v1399_v61 = vpop.eup %1398  ;;  %v420_v19 = vadd.f32 1e-06, %v388_v58  ;;  %v515_v26 = vmul.f32 %v1957_v9, %v477_v60 }
 0x187   :  { %v421_v1 = vadd.f32 1e-06, %v389_v57  ;;  %v1401_v63 = vpop.eup %1400  ;;  %v348_v2 = vpop.xlane.xlu1 %347  ;;  %1276 = vmatprep.mubr.bf16.mxu0 %v577_v44  ;;  %v552_v36 = vadd.f32 %v1964_v59, %v514_v25  ;;  %v478_v54 = vmul.f32 %v1399_v61, %v1839_v12 }
 0x188   :  { %v350_v3 = vpop.xlane.xlu0 %349  ;;  %1410 = vrsqrt.f32 %v420_v19  ;;  %v390_v27 = vmul.f32 0.03125, %v348_v2  ;;  %v479_v4 = vmul.f32 %v1401_v63, %v1848_v40  ;;  %v553_v12 = vadd.f32 %v1964_v59, %v515_v26 }
 0x189   :  { %v391_v32 = vmul.f32 0.03125, %v350_v3  ;;  %1412 = vrsqrt.f32 %v421_v1  ;;  %v578_v33 = vpack.c.bf16 %v552_v36, %v551_v10  ;;  %v516_v34 = vmul.f32 %v1957_v9, %v478_v54 }
 0x18a   :  { %v1403_v21 = vpop.eup %1402  ;;  %v422_v45 = vadd.f32 1e-06, %v390_v27  ;;  %v517_v42 = vmul.f32 %v1957_v9, %v479_v4 }
 0x18b   :  { %v423_v6 = vadd.f32 1e-06, %v391_v32  ;;  %v1405_v7 = vpop.eup %1404  ;;  %v352_v38 = vpop.xlane.xlu1 %351  ;;  %1277 = vmatmul.mubr.bf16.gmra.mrb[8].mxu0 %v578_v33  ;;  %v554_v29 = vadd.f32 %v1964_v59, %v516_v34  ;;  %v480_v41 = vmul.f32 %v1403_v21, %v1851_v14 }
 0x18c   :  { %v354_v28 = vpop.xlane.xlu0 %353  ;;  %1414 = vrsqrt.f32 %v422_v45  ;;  %v392_v40 = vmul.f32 0.03125, %v352_v38  ;;  %v481_v31 = vmul.f32 %v1405_v7, %v1860_v51  ;;  %v555_v14 = vadd.f32 %v1964_v59, %v517_v42 }
 0x18d   :  { %v393_v23 = vmul.f32 0.03125, %v354_v28  ;;  %1416 = vrsqrt.f32 %v423_v6  ;;  %v579_v47 = vpack.c.bf16 %v554_v29, %v553_v12  ;;  %v518_v30 = vmul.f32 %v1957_v9, %v480_v41 }
 0x18e   :  { %v1407_v55 = vpop.eup %1406  ;;  %v424_v49 = vadd.f32 1e-06, %v392_v40  ;;  %v519_v53 = vmul.f32 %v1957_v9, %v481_v31 }
 0x18f   :  { %v425_v50 = vadd.f32 1e-06, %v393_v23  ;;  %v1409_v37 = vpop.eup %1408  ;;  %v356_v17 = vpop.xlane.xlu1 %355  ;;  %1280 = vmatprep.mubr.bf16.mxu0 %v579_v47  ;;  %v556_v48 = vadd.f32 %v1964_v59, %v518_v30  ;;  %v482_v0 = vmul.f32 %v1407_v55, %v1863_v16 }
 0x190   :  { %v358_v52 = vpop.xlane.xlu0 %357  ;;  %1418 = vrsqrt.f32 %v424_v49  ;;  %v394_v56 = vmul.f32 0.03125, %v356_v17  ;;  %v483_v51 = vmul.f32 %v1409_v37, %v1872_v62  ;;  %v557_v16 = vadd.f32 %v1964_v59, %v519_v53 }
 0x191   :  { %v395_v58 = vmul.f32 0.03125, %v358_v52  ;;  %1420 = vrsqrt.f32 %v425_v50  ;;  %v580_v57 = vpack.c.bf16 %v556_v48, %v555_v14  ;;  %v520_v44 = vmul.f32 %v1957_v9, %v482_v0 }
 0x192   :  { %v1411_v25 = vpop.eup %1410  ;;  %v426_v60 = vadd.f32 1e-06, %v394_v56  ;;  %v521_v10 = vmul.f32 %v1957_v9, %v483_v51 }
 0x193   :  { %v427_v61 = vadd.f32 1e-06, %v395_v58  ;;  %v1413_v19 = vpop.eup %1412  ;;  %v360_v1 = vpop.xlane.xlu1 %359  ;;  %1281 = vmatmul.mubr.bf16.gmra.mrb[12].mxu0 %v580_v57  ;;  %v558_v2 = vadd.f32 %v1964_v59, %v520_v44  ;;  %v484_v3 = vmul.f32 %v1411_v25, %v1875_v18 }
 0x194   :  { %v362_v63 = vpop.xlane.xlu0 %361  ;;  %1422 = vrsqrt.f32 %v426_v60  ;;  %v396_v62 = vmul.f32 0.03125, %v360_v1  ;;  %v485_v27 = vmul.f32 %v1413_v19, %v1884_v35  ;;  %v559_v18 = vadd.f32 %v1964_v59, %v521_v10 }
 0x195   :  { %v397_v36 = vmul.f32 0.03125, %v362_v63  ;;  %1424 = vrsqrt.f32 %v427_v61  ;;  %v581_v54 = vpack.c.bf16 %v558_v2, %v557_v16  ;;  %v522_v26 = vmul.f32 %v1957_v9, %v484_v3 }
 0x196   :  { %v1415_v32 = vpop.eup %1414  ;;  %v428_v4 = vadd.f32 1e-06, %v396_v62  ;;  %v523_v38 = vmul.f32 %v1957_v9, %v485_v27 }
 0x197   :  { %v429_v33 = vadd.f32 1e-06, %v397_v36  ;;  %v1417_v34 = vpop.eup %1416  ;;  %v364_v21 = vpop.xlane.xlu1 %363  ;;  %1284 = vmatprep.mubr.bf16.mxu0 %v581_v54  ;;  %v560_v6 = vadd.f32 %v1964_v59, %v522_v26  ;;  %v486_v7 = vmul.f32 %v1415_v32, %v1887_v20 }
 0x198   :  { %v366_v45 = vpop.xlane.xlu0 %365  ;;  %1426 = vrsqrt.f32 %v428_v4  ;;  %v398_v28 = vmul.f32 0.03125, %v364_v21  ;;  %v487_v35 = vmul.f32 %v1417_v34, %v1896_v8  ;;  %v561_v31 = vadd.f32 %v1964_v59, %v523_v38 }
 0x199   :  { %v399_v12 = vmul.f32 0.03125, %v366_v45  ;;  %1428 = vrsqrt.f32 %v429_v33  ;;  %v582_v29 = vpack.c.bf16 %v560_v6, %v559_v18  ;;  %v524_v41 = vmul.f32 %v1957_v9, %v486_v7  ;;  %v1370_v45 = vld [vmem:[#allocation7 + $0x30] sm:$0xff]   ;;  %v1371_v18 = vld [vmem:[#allocation7 + $0x38] sm:$0xff]  }
 0x19a   :  { %v1419_v42 = vpop.eup %1418  ;;  %v430_v40 = vadd.f32 1e-06, %v398_v28  ;;  %v525_v49 = vmul.f32 %v1957_v9, %v487_v35  ;;  %1312 = vmatprep.subr.bf16.mxu1 %v1370_v45 }
 0x19b   :  { %v431_v23 = vadd.f32 1e-06, %v399_v12  ;;  %v1421_v47 = vpop.eup %1420  ;;  %v368_v30 = vpop.xlane.xlu1 %367  ;;  %1285 = vmatmul.mubr.bf16.gmra.mrb[16].mxu0 %v582_v29  ;;  %v562_v20 = vadd.f32 %v1964_v59, %v524_v41  ;;  %v488_v55 = vmul.f32 %v1419_v42, %v1899_v22  ;;  %1313 = vmatpush3.bf16.msra.mxu1 %v1370_v45 }
 0x19c   :  { %1430 = vrsqrt.f32 %v430_v40  ;;  %v400_v8 = vmul.f32 0.03125, %v368_v30  ;;  %v489_v50 = vmul.f32 %v1421_v47, %v1908_v11  ;;  %v563_v0 = vadd.f32 %v1964_v59, %v525_v49  ;;  %1314 = vmatprep.subr.bf16.mxu1 %v1371_v18 }
 0x19d   :  { %1432 = vrsqrt.f32 %v431_v23  ;;  %v583_v37 = vpack.c.bf16 %v562_v20, %v561_v31  ;;  %v526_v17 = vmul.f32 %v1957_v9, %v488_v55 }
 0x19e   :  { %v1423_v52 = vpop.eup %1422  ;;  %v432_v14 = vadd.f32 1e-06, %v400_v8  ;;  %v527_v56 = vmul.f32 %v1957_v9, %v489_v50 }
 0x19f   :  { %v1425_v48 = vpop.eup %1424  ;;  %1288 = vmatprep.mubr.bf16.mxu0 %v583_v37  ;;  %v564_v53 = vadd.f32 %v1964_v59, %v526_v17  ;;  %v490_v22 = vmul.f32 %v1423_v52, %v1911_v24  ;;  %1315 = vmatpush3.bf16.msra.mxu1 %v1371_v18 }
 0x1a0   :  { %1434 = vrsqrt.f32 %v432_v14  ;;  %v491_v58 = vmul.f32 %v1425_v48, %v1920_v13  ;;  %v565_v25 = vadd.f32 %v1964_v59, %v527_v56 }
 0x1a1   :  { %v584_v11 = vpack.c.bf16 %v564_v53, %v563_v0  ;;  %v528_v51 = vmul.f32 %v1957_v9, %v490_v22 }
 0x1a2   :  { %v1427_v57 = vpop.eup %1426  ;;  %v529_v19 = vmul.f32 %v1957_v9, %v491_v58 }
 0x1a3   :  { %v1429_v44 = vpop.eup %1428  ;;  %1289 = vmatmul.mubr.bf16.gmra.mrb[20].mxu0 %v584_v11  ;;  %v566_v60 = vadd.f32 %v1964_v59, %v528_v51  ;;  %v492_v61 = vmul.f32 %v1427_v57, %v1923_v5 }
 0x1a4   :  { %v493_v24 = vmul.f32 %v1429_v44, %v1932_v39  ;;  %v567_v2 = vadd.f32 %v1964_v59, %v529_v19 }
 0x1a5   :  { %v585_v1 = vpack.c.bf16 %v566_v60, %v565_v25  ;;  %v530_v63 = vmul.f32 %v1957_v9, %v492_v61 }
 0x1a6   :  { %v1431_v13 = vpop.eup %1430  ;;  %v531_v62 = vmul.f32 %v1957_v9, %v493_v24 }
 0x1a7   :  { %v1433_v16 = vpop.eup %1432  ;;  %1292 = vmatprep.mubr.bf16.mxu0 %v585_v1  ;;  %v568_v3 = vadd.f32 %v1964_v59, %v530_v63  ;;  %v494_v10 = vmul.f32 %v1431_v13, %v1935_v15 }
 0x1a8   :  { %v495_v5 = vmul.f32 %v1433_v16, %v1944_v43  ;;  %v569_v26 = vadd.f32 %v1964_v59, %v531_v62 }
 0x1a9   :  { %v586_v36 = vpack.c.bf16 %v568_v3, %v567_v2  ;;  %v532_v54 = vmul.f32 %v1957_v9, %v494_v10 }
 0x1aa   :  { %v1435_v39 = vpop.eup %1434  ;;  %v533_v4 = vmul.f32 %v1957_v9, %v495_v5 }
 0x1ab   :  { %1293 = vmatmul.mubr.bf16.gmra.mrb[24].mxu0 %v586_v36  ;;  %v570_v27 = vadd.f32 %v1964_v59, %v532_v54  ;;  %v496_v32 = vmul.f32 %v1435_v39, %v1947_v46  ;;  %v2062_v46 = vld [vmem:[%s2153_s5] ss:$0 sm:$0xff] }
 0x1ac   :  { %v571_v34 = vadd.f32 %v1964_v59, %v533_v4 }
 0x1ad   :  { %v587_v33 = vpack.c.bf16 %v570_v27, %v569_v26  ;;  %v534_v15 = vmul.f32 %v1957_v9, %v496_v32 }
 0x1af   :  { %1296 = vmatprep.mubr.bf16.mxu0 %v587_v33  ;;  %v572_v43 = vadd.f32 %v1964_v59, %v534_v15 }
 0x1b1   :  { %v588_v21 = vpack.c.bf16 %v572_v43, %v571_v34 }
 0x1b3   :  { %1297 = vmatmul.mubr.bf16.gmra.mrb[28].mxu0 %v588_v21 }
 0x24e   :  { %v1270_v6 = vpop.f32.mrb[0].mxu0 }
 0x24f   :  { %v703_v9 = vadd.f32 %v1270_v6, %v2062_v46  ;;  %v694_v7 = vpop.f32.mrb[1].mxu0 }
 0x250   :  { %v695_v38 = vadd.f32 %v2062_v46, %v694_v7  ;;  %v1271_v59 = vpop.f32.mrb[2].mxu0 }
 0x251   :  { %v706_v28 = vadd.f32 %v1271_v59, %v2062_v46  ;;  %v697_v12 = vpop.f32.mrb[3].mxu0  ;;  %v823_v29 = vmax.f32 %v703_v9, 0.0 }
 0x252   :  { %v698_v35 = vadd.f32 %v2062_v46, %v697_v12  ;;  %v821_v42 = vmax.f32 %v695_v38, 0.0 }
 0x253   :  { %v824_v41 = vmax.f32 %v706_v28, 0.0 }
 0x254   :  { %v822_v40 = vmax.f32 %v698_v35, 0.0 }
 0x255   :  { %v854_v23 = vpack.c.bf16 %v824_v41, %v823_v29 }
 0x256   :  { %v1274_v47 = vpop.f32.mrb[4].mxu0  ;;  %v853_v30 = vpack.c.bf16 %v822_v40, %v821_v42 }
 0x257   :  { %v719_v31 = vadd.f32 %v1274_v47, %v2062_v46  ;;  %v710_v20 = vpop.f32.mrb[5].mxu0 }
 0x258   :  { %v711_v55 = vadd.f32 %v2062_v46, %v710_v20  ;;  %v1275_v49 = vpop.f32.mrb[6].mxu0  ;;  %1316 = vmatprep.mubr.bf16.mxu1 %v853_v30 }
 0x259   :  { %v722_v8 = vadd.f32 %v1275_v49, %v2062_v46  ;;  %v713_v50 = vpop.f32.mrb[7].mxu0  ;;  %1317 = vmatmul.mubr.bf16.vlgmr.msra.gmra.mrb[0].mxu1 %v854_v23  ;;  %v827_v17 = vmax.f32 %v719_v31, 0.0 }
 0x25a   :  { %v714_v37 = vadd.f32 %v2062_v46, %v713_v50  ;;  %v825_v14 = vmax.f32 %v711_v55, 0.0 }
 0x25b   :  { %v828_v52 = vmax.f32 %v722_v8, 0.0 }
 0x25c   :  { %v826_v48 = vmax.f32 %v714_v37, 0.0 }
 0x25d   :  { %v856_v0 = vpack.c.bf16 %v828_v52, %v827_v17 }
 0x25e   :  { %v855_v53 = vpack.c.bf16 %v826_v48, %v825_v14  ;;  %v1278_v22 = vpop.f32.mrb[8].mxu0 }
 0x25f   :  { %v735_v56 = vadd.f32 %v1278_v22, %v2062_v46  ;;  %v726_v58 = vpop.f32.mrb[9].mxu0 }
 0x260   :  { %v727_v11 = vadd.f32 %v2062_v46, %v726_v58  ;;  %v1279_v51 = vpop.f32.mrb[10].mxu0  ;;  %1320 = vmatprep.mubr.bf16.mxu1 %v855_v53 }
 0x261   :  { %v738_v57 = vadd.f32 %v1279_v51, %v2062_v46  ;;  %v729_v44 = vpop.f32.mrb[11].mxu0  ;;  %1321 = vmatmul.mubr.bf16.gmra.mrb[4].mxu1 %v856_v0  ;;  %v831_v60 = vmax.f32 %v735_v56, 0.0 }
 0x262   :  { %v730_v25 = vadd.f32 %v2062_v46, %v729_v44  ;;  %v829_v19 = vmax.f32 %v727_v11, 0.0 }
 0x263   :  { %v832_v61 = vmax.f32 %v738_v57, 0.0 }
 0x264   :  { %v830_v24 = vmax.f32 %v730_v25, 0.0 }
 0x265   :  { %v858_v1 = vpack.c.bf16 %v832_v61, %v831_v60 }
 0x266   :  { %v857_v63 = vpack.c.bf16 %v830_v24, %v829_v19  ;;  %v1282_v13 = vpop.f32.mrb[12].mxu0 }
 0x267   :  { %v751_v16 = vadd.f32 %v1282_v13, %v2062_v46  ;;  %v742_v2 = vpop.f32.mrb[13].mxu0 }
 0x268   :  { %v743_v3 = vadd.f32 %v2062_v46, %v742_v2  ;;  %v1283_v10 = vpop.f32.mrb[14].mxu0  ;;  %1324 = vmatprep.mubr.bf16.mxu1 %v857_v63 }
 0x269   :  { %v754_v62 = vadd.f32 %v1283_v10, %v2062_v46  ;;  %v745_v5 = vpop.f32.mrb[15].mxu0  ;;  %1325 = vmatmul.mubr.bf16.gmra.mrb[8].mxu1 %v858_v1  ;;  %v835_v54 = vmax.f32 %v751_v16, 0.0 }
 0x26a   :  { %v746_v36 = vadd.f32 %v2062_v46, %v745_v5  ;;  %v833_v26 = vmax.f32 %v743_v3, 0.0 }
 0x26b   :  { %v836_v39 = vmax.f32 %v754_v62, 0.0 }
 0x26c   :  { %v834_v27 = vmax.f32 %v746_v36, 0.0  ;;  %v2099_v36 = vld [vmem:[%s2155_s7] ss:$0 sm:$0xff]  ;;  %s1569_s7 = smov [#allocation8]  }
 0x26d   :  { %v860_v32 = vpack.c.bf16 %v836_v39, %v835_v54  ;;  %s1170_s26 = sshll.u32 %s1569_s7, 4  ;;  %s1171_s26 = int_to_ptr.vmem [resolvable:$true] %s1170_s26 }
 0x26e   :  { %v859_v4 = vpack.c.bf16 %v834_v27, %v833_v26  ;;  %v1286_v33 = vpop.f32.mrb[16].mxu0  ;;  %s1534_s27 = scalar_lea.vmem %s1171_s26, 4096  ;;  %p1539_p11 = scmp.lt.s32.totalorder %s1171_s26, %s1171_s26 }
 0x26f   :  { %v767_v15 = vadd.f32 %v1286_v33, %v2062_v46  ;;  %v758_v34 = vpop.f32.mrb[17].mxu0  ;;  %p1535_p10 = scmp.ne.s32.totalorder %s1171_s26, %s1534_s27  ;;  %p1540_p12 = scmp.lt.s32.totalorder %s1534_s27, %s1534_s27 }
 0x270   :  { %v759_v43 = vadd.f32 %v2062_v46, %v758_v34  ;;  %v1287_v21 = vpop.f32.mrb[18].mxu0  ;;  %1328 = vmatprep.mubr.bf16.mxu1 %v859_v4  ;;  %v1437_v34 = vld [vmem:[#allocation2] sm:$0xff] }
 0x271   :  { %v770_v45 = vadd.f32 %v1287_v21, %v2062_v46  ;;  %v761_v18 = vpop.f32.mrb[19].mxu0  ;;  %1329 = vmatmul.mubr.bf16.gmra.mrb[12].mxu1 %v860_v32  ;;  %v839_v9 = vmax.f32 %v767_v15, 0.0  ;;  %v1436_v32 = vld [vmem:[#allocation2 + $0x10] sm:$0xff]  ;;  %p1541_p13 = por %p1540_p12, %p1539_p11 }
 0x272   :  { %v762_v6 = vadd.f32 %v2062_v46, %v761_v18  ;;  %v837_v38 = vmax.f32 %v759_v43, 0.0 }
 0x273   :  { %v840_v7 = vmax.f32 %v770_v45, 0.0  ;;  %v1438_v45 = vld [vmem:[#allocation2 + $0x18] sm:$0xff]  ;;  %p1542_p0 = pnand %p1541_p13, %p1535_p10 }
 0x274   :  { %v838_v59 = vmax.f32 %v762_v6, 0.0  ;;  %v1439_v6 = vld [vmem:[#allocation2 + $0x8] sm:$0xff] }
 0x275   :  { %v862_v28 = vpack.c.bf16 %v840_v7, %v839_v9 }
 0x276   :  { %v861_v12 = vpack.c.bf16 %v838_v59, %v837_v38  ;;  %v1290_v35 = vpop.f32.mrb[20].mxu0 }
 0x277   :  { %v783_v29 = vadd.f32 %v1290_v35, %v2062_v46  ;;  %v774_v41 = vpop.f32.mrb[21].mxu0  ;;  %v1440_v35 = vld [vmem:[#allocation2 + $0x30] sm:$0xff] }
 0x278   :  { %v775_v42 = vadd.f32 %v2062_v46, %v774_v41  ;;  %v1291_v40 = vpop.f32.mrb[22].mxu0  ;;  %1332 = vmatprep.mubr.bf16.mxu1 %v861_v12 }
 0x279   :  { %v786_v23 = vadd.f32 %v1291_v40, %v2062_v46  ;;  %v777_v47 = vpop.f32.mrb[23].mxu0  ;;  %1333 = vmatmul.mubr.bf16.gmra.mrb[16].mxu1 %v862_v28  ;;  %v843_v31 = vmax.f32 %v783_v29, 0.0  ;;  %v1441_v40 = vld [vmem:[#allocation2 + $0x20] sm:$0xff] }
 0x27a   :  { %v778_v30 = vadd.f32 %v2062_v46, %v777_v47  ;;  %v841_v55 = vmax.f32 %v775_v42, 0.0 }
 0x27b   :  { %v844_v20 = vmax.f32 %v786_v23, 0.0 }
 0x27c   :  { %v842_v49 = vmax.f32 %v778_v30, 0.0  ;;  %v1442_v30 = vld [vmem:[#allocation2 + $0x38] sm:$0xff] }
 0x27d   :  { %v864_v8 = vpack.c.bf16 %v844_v20, %v843_v31  ;;  %v1443_v20 = vld [vmem:[#allocation2 + $0x28] sm:$0xff] }
 0x27e   :  { %v863_v50 = vpack.c.bf16 %v842_v49, %v841_v55  ;;  %v1294_v37 = vpop.f32.mrb[24].mxu0 }
 0x27f   :  { %v799_v17 = vadd.f32 %v1294_v37, %v2062_v46  ;;  %v790_v52 = vpop.f32.mrb[25].mxu0 }
 0x280   :  { %v791_v14 = vadd.f32 %v2062_v46, %v790_v52  ;;  %v1295_v48 = vpop.f32.mrb[26].mxu0  ;;  %1336 = vmatprep.mubr.bf16.mxu1 %v863_v50  ;;  %v1444_v52 = vld [vmem:[#allocation2 + $0x50] sm:$0xff] }
 0x281   :  { %v802_v0 = vadd.f32 %v1295_v48, %v2062_v46  ;;  %v793_v53 = vpop.f32.mrb[27].mxu0  ;;  %1337 = vmatmul.mubr.bf16.gmra.mrb[20].mxu1 %v864_v8  ;;  %v847_v56 = vmax.f32 %v799_v17, 0.0 }
 0x282   :  { %v794_v22 = vadd.f32 %v2062_v46, %v793_v53  ;;  %v845_v11 = vmax.f32 %v791_v14, 0.0  ;;  %v1445_v53 = vld [vmem:[#allocation2 + $0x40] sm:$0xff] }
 0x283   :  { %v848_v58 = vmax.f32 %v802_v0, 0.0 }
 0x284   :  { %v846_v51 = vmax.f32 %v794_v22, 0.0 }
 0x285   :  { %v866_v57 = vpack.c.bf16 %v848_v58, %v847_v56  ;;  %v1446_v58 = vld [vmem:[#allocation2 + $0x58] sm:$0xff] }
 0x286   :  { %v865_v44 = vpack.c.bf16 %v846_v51, %v845_v11  ;;  %v1298_v25 = vpop.f32.mrb[28].mxu0  ;;  %v1447_v51 = vld [vmem:[#allocation2 + $0x48] sm:$0xff] }
 0x287   :  { %v815_v60 = vadd.f32 %v1298_v25, %v2062_v46  ;;  %v806_v61 = vpop.f32.mrb[29].mxu0 }
 0x288   :  { %v807_v19 = vadd.f32 %v2062_v46, %v806_v61  ;;  %v1299_v24 = vpop.f32.mrb[30].mxu0  ;;  %1340 = vmatprep.mubr.bf16.mxu1 %v865_v44 }
 0x289   :  { %v818_v1 = vadd.f32 %v1299_v24, %v2062_v46  ;;  %v809_v63 = vpop.f32.mrb[31].mxu0  ;;  %1341 = vmatmul.mubr.bf16.gmra.mrb[24].mxu1 %v866_v57  ;;  %v851_v16 = vmax.f32 %v815_v60, 0.0  ;;  %v1448_v24 = vld [vmem:[#allocation2 + $0x70] sm:$0xff] }
 0x28a   :  { %v810_v13 = vadd.f32 %v2062_v46, %v809_v63  ;;  %v849_v3 = vmax.f32 %v807_v19, 0.0 }
 0x28b   :  { %v852_v2 = vmax.f32 %v818_v1, 0.0 }
 0x28c   :  { %v850_v10 = vmax.f32 %v810_v13, 0.0 }
 0x28d   :  { %v868_v62 = vpack.c.bf16 %v852_v2, %v851_v16  ;;  %v1449_v16 = vld [vmem:[#allocation2 + $0x60] sm:$0xff] }
 0x28e   :  { %v867_v5 = vpack.c.bf16 %v850_v10, %v849_v3  ;;  %v1450_v10 = vld [vmem:[#allocation2 + $0x78] sm:$0xff] }
 0x290   :  { %1344 = vmatprep.mubr.bf16.mxu1 %v867_v5  ;;  %v1451_v5 = vld [vmem:[#allocation2 + $0x68] sm:$0xff] }
 0x291   :  { %1345 = vmatmul.mubr.bf16.gmra.mrb[28].mxu1 %v868_v62 }
 0x32c   :  { %v1318_v54 = vpop.f32.mrb[0].mxu1 }
 0x32d   :  { %v983_v39 = vadd.f32 %v1318_v54, %v2099_v36  ;;  %v974_v26 = vpop.f32.mrb[1].mxu1 }
 0x32e   :  { %v975_v27 = vadd.f32 %v2099_v36, %v974_v26  ;;  %v1319_v46 = vpop.f32.mrb[2].mxu1 }
 0x32f   :  { %v1103_v4 = vadd.f32 %v1436_v32, %v983_v39  ;;  %v986_v33 = vadd.f32 %v1319_v46, %v2099_v36  ;;  %v977_v15 = vpop.f32.mrb[3].mxu1 }
 0x330   :  { %v1101_v43 = vadd.f32 %v1437_v34, %v975_v27  ;;  %v978_v21 = vadd.f32 %v2099_v36, %v977_v15 }
 0x331   :  { %1135 = vst [vmem:[#allocation8 + $0x10] sm:$0xff] %v1103_v4  ;;  %v1104_v18 = vadd.f32 %v1438_v45, %v986_v33  ;;  %v1452_v4 = vld [vmem:[#allocation2 + $0x90] sm:$0xff] }
 0x332   :  { %1133 = vst [vmem:[#allocation8] sm:$0xff] %v1101_v43  ;;  %v1102_v9 = vadd.f32 %v1439_v6, %v978_v21  ;;  %v1453_v43 = vld [vmem:[#allocation2 + $0x80] sm:$0xff] }
 0x333   :  { %1136 = vst [vmem:[#allocation8 + $0x18] sm:$0xff] %v1104_v18  ;;  %v1454_v18 = vld [vmem:[#allocation2 + $0x98] sm:$0xff] }
 0x334   :  { %1134 = vst [vmem:[#allocation8 + $0x8] sm:$0xff] %v1102_v9  ;;  %v1322_v7 = vpop.f32.mrb[4].mxu1  ;;  %v1455_v9 = vld [vmem:[#allocation2 + $0x88] sm:$0xff] }
 0x335   :  { %v999_v38 = vadd.f32 %v1322_v7, %v2099_v36  ;;  %v990_v59 = vpop.f32.mrb[5].mxu1 }
 0x336   :  { %v991_v28 = vadd.f32 %v2099_v36, %v990_v59  ;;  %v1323_v12 = vpop.f32.mrb[6].mxu1 }
 0x337   :  { %v1107_v29 = vadd.f32 %v1440_v35, %v999_v38  ;;  %v1002_v41 = vadd.f32 %v1323_v12, %v2099_v36  ;;  %v993_v42 = vpop.f32.mrb[7].mxu1 }
 0x338   :  { %v1105_v23 = vadd.f32 %v1441_v40, %v991_v28  ;;  %v994_v47 = vadd.f32 %v2099_v36, %v993_v42 }
 0x339   :  { %1139 = vst [vmem:[#allocation8 + $0x30] sm:$0xff] %v1107_v29  ;;  %v1108_v31 = vadd.f32 %v1442_v30, %v1002_v41  ;;  %v1456_v29 = vld [vmem:[#allocation2 + $0xb0] sm:$0xff] }
 0x33a   :  { %1137 = vst [vmem:[#allocation8 + $0x20] sm:$0xff] %v1105_v23  ;;  %v1106_v55 = vadd.f32 %v1443_v20, %v994_v47  ;;  %v1457_v23 = vld [vmem:[#allocation2 + $0xa0] sm:$0xff] }
 0x33b   :  { %1140 = vst [vmem:[#allocation8 + $0x38] sm:$0xff] %v1108_v31  ;;  %v1458_v31 = vld [vmem:[#allocation2 + $0xb8] sm:$0xff] }
 0x33c   :  { %1138 = vst [vmem:[#allocation8 + $0x28] sm:$0xff] %v1106_v55  ;;  %v1326_v49 = vpop.f32.mrb[8].mxu1  ;;  %v1459_v55 = vld [vmem:[#allocation2 + $0xa8] sm:$0xff] }
 0x33d   :  { %v1015_v8 = vadd.f32 %v1326_v49, %v2099_v36  ;;  %v1006_v50 = vpop.f32.mrb[9].mxu1 }
 0x33e   :  { %v1007_v37 = vadd.f32 %v2099_v36, %v1006_v50  ;;  %v1327_v17 = vpop.f32.mrb[10].mxu1 }
 0x33f   :  { %v1111_v14 = vadd.f32 %v1444_v52, %v1015_v8  ;;  %v1018_v48 = vadd.f32 %v1327_v17, %v2099_v36  ;;  %v1009_v0 = vpop.f32.mrb[11].mxu1 }
 0x340   :  { %v1109_v22 = vadd.f32 %v1445_v53, %v1007_v37  ;;  %v1010_v56 = vadd.f32 %v2099_v36, %v1009_v0 }
 0x341   :  { %1143 = vst [vmem:[#allocation8 + $0x50] sm:$0xff] %v1111_v14  ;;  %v1112_v11 = vadd.f32 %v1446_v58, %v1018_v48  ;;  %v1460_v14 = vld [vmem:[#allocation2 + $0xd0] sm:$0xff] }
 0x342   :  { %1141 = vst [vmem:[#allocation8 + $0x40] sm:$0xff] %v1109_v22  ;;  %v1110_v57 = vadd.f32 %v1447_v51, %v1010_v56  ;;  %v1461_v22 = vld [vmem:[#allocation2 + $0xc0] sm:$0xff] }
 0x343   :  { %1144 = vst [vmem:[#allocation8 + $0x58] sm:$0xff] %v1112_v11  ;;  %v1462_v11 = vld [vmem:[#allocation2 + $0xd8] sm:$0xff] }
 0x344   :  { %1142 = vst [vmem:[#allocation8 + $0x48] sm:$0xff] %v1110_v57  ;;  %v1330_v44 = vpop.f32.mrb[12].mxu1  ;;  %v1463_v57 = vld [vmem:[#allocation2 + $0xc8] sm:$0xff] }
 0x345   :  { %v1031_v25 = vadd.f32 %v1330_v44, %v2099_v36  ;;  %v1022_v60 = vpop.f32.mrb[13].mxu1 }
 0x346   :  { %v1023_v61 = vadd.f32 %v2099_v36, %v1022_v60  ;;  %v1331_v19 = vpop.f32.mrb[14].mxu1 }
 0x347   :  { %v1115_v1 = vadd.f32 %v1448_v24, %v1031_v25  ;;  %v1034_v63 = vadd.f32 %v1331_v19, %v2099_v36  ;;  %v1025_v13 = vpop.f32.mrb[15].mxu1 }
 0x348   :  { %v1113_v2 = vadd.f32 %v1449_v16, %v1023_v61  ;;  %v1026_v3 = vadd.f32 %v2099_v36, %v1025_v13 }
 0x349   :  { %1147 = vst [vmem:[#allocation8 + $0x70] sm:$0xff] %v1115_v1  ;;  %v1116_v62 = vadd.f32 %v1450_v10, %v1034_v63  ;;  %v1464_v1 = vld [vmem:[#allocation2 + $0xf0] sm:$0xff] }
 0x34a   :  { %1145 = vst [vmem:[#allocation8 + $0x60] sm:$0xff] %v1113_v2  ;;  %v1114_v54 = vadd.f32 %v1451_v5, %v1026_v3  ;;  %v1465_v2 = vld [vmem:[#allocation2 + $0xe0] sm:$0xff] }
 0x34b   :  { %1148 = vst [vmem:[#allocation8 + $0x78] sm:$0xff] %v1116_v62  ;;  %v1466_v62 = vld [vmem:[#allocation2 + $0xf8] sm:$0xff] }
 0x34c   :  { %1146 = vst [vmem:[#allocation8 + $0x68] sm:$0xff] %v1114_v54  ;;  %v1334_v39 = vpop.f32.mrb[16].mxu1  ;;  %v1467_v54 = vld [vmem:[#allocation2 + $0xe8] sm:$0xff] }
 0x34d   :  { %v1047_v26 = vadd.f32 %v1334_v39, %v2099_v36  ;;  %v1038_v27 = vpop.f32.mrb[17].mxu1 }
 0x34e   :  { %v1039_v46 = vadd.f32 %v2099_v36, %v1038_v27  ;;  %v1335_v32 = vpop.f32.mrb[18].mxu1 }
 0x34f   :  { %v1119_v33 = vadd.f32 %v1452_v4, %v1047_v26  ;;  %v1050_v15 = vadd.f32 %v1335_v32, %v2099_v36  ;;  %v1041_v34 = vpop.f32.mrb[19].mxu1 }
 0x350   :  { %v1117_v21 = vadd.f32 %v1453_v43, %v1039_v46  ;;  %v1042_v45 = vadd.f32 %v2099_v36, %v1041_v34 }
 0x351   :  { %1151 = vst [vmem:[#allocation8 + $0x90] sm:$0xff] %v1119_v33  ;;  %v1120_v6 = vadd.f32 %v1454_v18, %v1050_v15 }
 0x352   :  { %1149 = vst [vmem:[#allocation8 + $0x80] sm:$0xff] %v1117_v21  ;;  %v1118_v7 = vadd.f32 %v1455_v9, %v1042_v45 }
 0x353   :  { %1152 = vst [vmem:[#allocation8 + $0x98] sm:$0xff] %v1120_v6 }
 0x354   :  { %1150 = vst [vmem:[#allocation8 + $0x88] sm:$0xff] %v1118_v7  ;;  %v1338_v38 = vpop.f32.mrb[20].mxu1 }
 0x355   :  { %v1063_v59 = vadd.f32 %v1338_v38, %v2099_v36  ;;  %v1054_v28 = vpop.f32.mrb[21].mxu1 }
 0x356   :  { %v1055_v12 = vadd.f32 %v2099_v36, %v1054_v28  ;;  %v1339_v35 = vpop.f32.mrb[22].mxu1 }
 0x357   :  { %v1123_v41 = vadd.f32 %v1456_v29, %v1063_v59  ;;  %v1066_v42 = vadd.f32 %v1339_v35, %v2099_v36  ;;  %v1057_v40 = vpop.f32.mrb[23].mxu1 }
 0x358   :  { %v1121_v47 = vadd.f32 %v1457_v23, %v1055_v12  ;;  %v1058_v30 = vadd.f32 %v2099_v36, %v1057_v40 }
 0x359   :  { %1155 = vst [vmem:[#allocation8 + $0xb0] sm:$0xff] %v1123_v41  ;;  %v1124_v20 = vadd.f32 %v1458_v31, %v1066_v42 }
 0x35a   :  { %1153 = vst [vmem:[#allocation8 + $0xa0] sm:$0xff] %v1121_v47  ;;  %v1122_v49 = vadd.f32 %v1459_v55, %v1058_v30 }
 0x35b   :  { %1156 = vst [vmem:[#allocation8 + $0xb8] sm:$0xff] %v1124_v20 }
 0x35c   :  { %1154 = vst [vmem:[#allocation8 + $0xa8] sm:$0xff] %v1122_v49  ;;  %v1342_v8 = vpop.f32.mrb[24].mxu1 }
 0x35d   :  { %v1079_v50 = vadd.f32 %v1342_v8, %v2099_v36  ;;  %v1070_v37 = vpop.f32.mrb[25].mxu1 }
 0x35e   :  { %v1071_v17 = vadd.f32 %v2099_v36, %v1070_v37  ;;  %v1343_v52 = vpop.f32.mrb[26].mxu1 }
 0x35f   :  { %v1127_v48 = vadd.f32 %v1460_v14, %v1079_v50  ;;  %v1082_v0 = vadd.f32 %v1343_v52, %v2099_v36  ;;  %v1073_v53 = vpop.f32.mrb[27].mxu1 }
 0x360   :  { %v1125_v56 = vadd.f32 %v1461_v22, %v1071_v17  ;;  %v1074_v58 = vadd.f32 %v2099_v36, %v1073_v53 }
 0x361   :  { %1159 = vst [vmem:[#allocation8 + $0xd0] sm:$0xff] %v1127_v48  ;;  %v1128_v51 = vadd.f32 %v1462_v11, %v1082_v0 }
 0x362   :  { %1157 = vst [vmem:[#allocation8 + $0xc0] sm:$0xff] %v1125_v56  ;;  %v1126_v44 = vadd.f32 %v1463_v57, %v1074_v58 }
 0x363   :  { %1160 = vst [vmem:[#allocation8 + $0xd8] sm:$0xff] %v1128_v51 }
 0x364   :  { %1158 = vst [vmem:[#allocation8 + $0xc8] sm:$0xff] %v1126_v44  ;;  %v1346_v25 = vpop.f32.mrb[28].mxu1 }
 0x365   :  { %v1095_v60 = vadd.f32 %v1346_v25, %v2099_v36  ;;  %v1086_v61 = vpop.f32.mrb[29].mxu1 }
 0x366   :  { %v1087_v19 = vadd.f32 %v2099_v36, %v1086_v61  ;;  %v1347_v24 = vpop.f32.mrb[30].mxu1 }
 0x367   :  { %v1131_v63 = vadd.f32 %v1464_v1, %v1095_v60  ;;  %v1098_v13 = vadd.f32 %v1347_v24, %v2099_v36  ;;  %v1089_v16 = vpop.f32.mrb[31].mxu1 }
 0x368   :  { %v1129_v3 = vadd.f32 %v1465_v2, %v1087_v19  ;;  %v1090_v10 = vadd.f32 %v2099_v36, %v1089_v16 }
 0x369   :  { %1163 = vst [vmem:[#allocation8 + $0xf0] sm:$0xff] %v1131_v63  ;;  %v1132_v5 = vadd.f32 %v1466_v62, %v1098_v13 }
 0x36a   :  { %1161 = vst [vmem:[#allocation8 + $0xe0] sm:$0xff] %v1129_v3  ;;  %v1130_v39 = vadd.f32 %v1467_v54, %v1090_v10 }
 0x36b   :  { %1164 = vst [vmem:[#allocation8 + $0xf8] sm:$0xff] %v1132_v5 }
 0x36c   :  { %1162 = vst [vmem:[#allocation8 + $0xe8] sm:$0xff] %v1130_v39 }
 0x36d   :  { %1545 = shalt.err (!%p1542_p0)
}
 0x36e   :  { %s1546_s9 = scalar_lea.hbm %s2156_s8, 4096 }
 0x36f   :  { %p1547_p1 = scmp.ne.s32.totalorder %s2156_s8, %s1546_s9  ;;  %p1550_p2 = scmp.lt.u32.totalorder %s1546_s9, %s2156_s8 }
 0x371   :  { %p1552_p3 = pnand %p1550_p2, %p1547_p1 }
 0x373   :  { %1555 = shalt.err (!%p1552_p3)
}
 0x374   :  { %1176 = dma.vmem_to_hbm [thread:$0]  %s1171_s26, 4096, %s2156_s8, [#allocation4], %s1566_s4, %s1566_s4, %s1567_s28  }
 0x375   :  { %1560 = dma.done.wait [#allocation4], 4096  }
 0x376   :  { %1561 = vsyncadd [#allocation4], 4294963200 }
 0x377   :  { %1180 = vsyncpa [#allocation3], 1 }
 0x378   :  { %1181 = vsyncpa [#allocation6], 1 }
 0x379   :  { %1182 = vsyncpa [#allocation4], 1 }

</bundles_post_ra>
